<compile_context>
chip_gen: v7x
topology: tpu7x:2x2x1
jax: 0.10.0
libtpu: 0.0.40
codegen_flags: <defaults>
</compile_context>

<pallas_src>
import functools

import jax
import jax.numpy as jnp
from jax.experimental import pallas as pl
from jax.experimental.pallas import tpu as pltpu


def _round_up(v, m):
    return (v + m - 1) // m * m


def _tile_config():
    """(tile_n, vmem_limit_bytes) per TPU generation."""
    vmem_cap = 128 * 1024 * 1024
    kind = ""
    try:
        vmem_cap = pltpu.get_tpu_info().vmem_capacity_bytes
    except Exception:
        pass
    try:
        kind = jax.devices()[0].device_kind.lower()
    except Exception:
        pass
    if vmem_cap <= 64 * 1024 * 1024:
        # v7x-class: 64 MiB/TC.  ~310-row DMA/compute crossover; leave Mosaic headroom.
        return 512, 56 * 1024 * 1024
    if "v6" in kind:
        # v6e: ~670-row crossover to hide a cold expert-weight fetch under one tile.
        return 768, 104 * 1024 * 1024
    # v5e and anything else: 256 rows already hides the weight DMA; favor small padding.
    return 256, 96 * 1024 * 1024


def _expert_tile_kernel(te_ref, cnt_ref, x_ref, w1_ref, b1_ref, w2_ref, b2_ref, out_ref):
    """One token tile x one expert:  out = relu(x @ W1 + b1) @ W2 + b2.

    Hidden dim is processed in <=512-lane chunks accumulated into a (tile_n, Dp)
    f32 accumulator; pure-padding tiles (cnt == 0) skip all compute.
    """
    del te_ref  # tile->expert map is consumed only by the index_maps.
    t = pl.program_id(0)

    @pl.when(cnt_ref[t] > 0)
    def _compute():
        x = x_ref[...]                                   # (tile_n, Dp) bf16
        tile_n = x.shape[0]
        dp = out_ref.shape[-1]
        fp = w1_ref.shape[-1]
        chunk = 512 if fp % 512 == 0 else (256 if fp % 256 == 0 else 128)
        acc = jnp.zeros((tile_n, dp), jnp.float32)
        for c in range(fp // chunk):                     # static, fully unrolled
            lo, hi = c * chunk, (c + 1) * chunk
            h = jnp.dot(x, w1_ref[:, lo:hi], preferred_element_type=jnp.float32)
            h = jnp.maximum(h + b1_ref[:, lo:hi], 0.0)
            acc = acc + jnp.dot(h.astype(jnp.bfloat16), w2_ref[lo:hi, :],
                                preferred_element_type=jnp.float32)
        out_ref[...] = (acc + b2_ref[...]).astype(out_ref.dtype)

    @pl.when(cnt_ref[t] == 0)
    def _skip():
        # Cheap (<= E tiles total); rows are never gathered back anyway.
        out_ref[...] = jnp.zeros_like(out_ref)


@functools.partial(jax.jit, static_argnames=("tile_n",))
def simple_moe_forward(x, wr, br, w1, b1, w2, b2, *, tile_n=None):
    """x: (B, S, D) f32.  Returns (outputs (B, S, D) f32, load_balance_loss ())."""
    cfg_tile_n, vmem_limit = _tile_config()
    if tile_n is None:
        tile_n = cfg_tile_n

    B, S, D = x.shape
    E = wr.shape[1]
    F = w1.shape[2]
    N = B * S
    x_flat = x.reshape(N, D).astype(jnp.float32)

    # ---- Router once, in f32 (argmax(softmax(l)) == argmax(l)). ----
    logits = x_flat @ wr + br.reshape(1, E)
    expert_idx = jnp.argmax(logits, axis=-1).astype(jnp.int32)

    # ---- Load-balance loss from an exact int bincount. ----
    g = jnp.bincount(expert_idx, length=E).astype(jnp.int32)
    usage = g.astype(jnp.float32)
    usage = usage / jnp.sum(usage)
    load_balance_loss = jnp.mean((usage - 1.0 / E) ** 2)

    # ---- Group tokens by expert; pad each group to a multiple of tile_n. ----
    sort_idx = jnp.argsort(expert_idx).astype(jnp.int32)     # tokens grouped by expert
    sorted_e = expert_idx[sort_idx]
    tiles_per_e = (g + tile_n - 1) // tile_n
    tile_starts = jnp.concatenate(
        [jnp.zeros((1,), jnp.int32), jnp.cumsum(tiles_per_e).astype(jnp.int32)])
    grp_start = jnp.concatenate(
        [jnp.zeros((1,), jnp.int32), jnp.cumsum(g).astype(jnp.int32)])[:-1]
    pad_start = tile_starts[:-1] * tile_n            # padded row where group e begins
    # sorted-position -> padded destination row
    dest = pad_start[sorted_e] + (jnp.arange(N, dtype=jnp.int32) - grp_start[sorted_e])

    # Static upper bound on tile count: sum_e ceil(g_e/tile_n) <= ceil(N/tile_n) + E.
    num_tiles = -(-N // tile_n) + E
    rows = num_tiles * tile_n

    # tile -> expert map and tile -> valid-row count (both scalar-prefetched to SMEM).
    tile_ids = jnp.arange(num_tiles, dtype=jnp.int32)
    tile_expert = jnp.searchsorted(tile_starts[1:], tile_ids, side="right")
    tile_expert = jnp.minimum(tile_expert, E - 1).astype(jnp.int32)
    tile_count = jnp.clip(
        pad_start[tile_expert] + g[tile_expert] - tile_ids * tile_n, 0, tile_n
    ).astype(jnp.int32)

    # ---- Lane-dense / MXU-aligned padding (multiples of 128) + bf16 MXU feed. ----
    Dp = _round_up(D, 128)
    Fp = _round_up(F, 128)

    # Gather-based build of the grouped/padded activations (only tiny int32 scatters).
    row_src = jnp.zeros((rows,), jnp.int32).at[dest].set(sort_idx)
    row_valid = jnp.zeros((rows,), jnp.bool_).at[dest].set(True)
    x_rows = x_flat[row_src].astype(jnp.bfloat16)            # (rows, D) gather
    x_rows = jnp.where(row_valid[:, None], x_rows, jnp.bfloat16(0))
    x_pad = jnp.pad(x_rows, ((0, 0), (0, Dp - D)))           # (rows, Dp) bf16

    w1_p = jnp.pad(w1, ((0, 0), (0, Dp - D), (0, Fp - F))).astype(jnp.bfloat16)
    w2_p = jnp.pad(w2, ((0, 0), (0, Fp - F), (0, Dp - D))).astype(jnp.bfloat16)
    b1_p = jnp.pad(b1, ((0, 0), (0, Fp - F))).reshape(E, 1, Fp).astype(jnp.float32)
    b2_p = jnp.pad(b2, ((0, 0), (0, Dp - D))).reshape(E, 1, Dp).astype(jnp.float32)

    out_pad = pl.pallas_call(
        _expert_tile_kernel,
        out_shape=jax.ShapeDtypeStruct((rows, Dp), jnp.bfloat16),   # bf16 writeback
        grid_spec=pltpu.PrefetchScalarGridSpec(
            num_scalar_prefetch=2,
            grid=(num_tiles,),
            in_specs=[
                pl.BlockSpec((tile_n, Dp), lambda t, te, cnt: (t, 0)),                    # tokens
                pl.BlockSpec((pl.Squeezed(), Dp, Fp), lambda t, te, cnt: (te[t], 0, 0)),  # W1
                pl.BlockSpec((pl.Squeezed(), 1, Fp), lambda t, te, cnt: (te[t], 0, 0)),   # b1
                pl.BlockSpec((pl.Squeezed(), Fp, Dp), lambda t, te, cnt: (te[t], 0, 0)),  # W2
                pl.BlockSpec((pl.Squeezed(), 1, Dp), lambda t, te, cnt: (te[t], 0, 0)),   # b2
            ],
            out_specs=pl.BlockSpec((tile_n, Dp), lambda t, te, cnt: (t, 0)),
        ),
        compiler_params=pltpu.CompilerParams(
            dimension_semantics=("parallel",),        # token tiles are independent
            vmem_limit_bytes=vmem_limit,              # per-generation budget
        ),
    )(tile_expert, tile_count, x_pad, w1_p, b1_p, w2_p, b2_p)

    # ---- Gather the grouped/padded result back into original token order. ----
    inv = jnp.zeros((N,), jnp.int32).at[sort_idx].set(jnp.arange(N, dtype=jnp.int32))
    token_row = dest[inv]                              # original token -> padded row
    out_flat = out_pad[token_row, :D].astype(jnp.float32)
    return out_flat.reshape(B, S, D), load_balance_loss


def _reference_forward(x, wr, br, w1, b1, w2, b2):
    """Pure-JAX f32 reference mirroring the PyTorch module (eval-mode dropout)."""
    B, S, D = x.shape
    E = wr.shape[1]
    x_flat = x.reshape(-1, D)
    logits = x_flat @ wr + br[0]
    idx = jnp.argmax(jax.nn.softmax(logits, axis=-1), axis=-1)
    outs = jnp.zeros_like(x_flat)
    for e in range(E):
        h = jnp.maximum(x_flat @ w1[e] + b1[e], 0.0)
        y = h @ w2[e] + b2[e]
        outs = jnp.where((idx == e)[:, None], y, outs)
    usage = jnp.bincount(idx, minlength=E, length=E).astype(jnp.float32)
    usage = usage / usage.sum()
    lbl = jnp.mean((usage - 1.0 / E) ** 2)
    return outs.reshape(B, S, D), lbl


if __name__ == "__main__":
    batch, seq, d_model = 2, 8, 32
    num_experts = 8
    d_ff = d_model * 4

    key = jax.random.PRNGKey(0)
    kx, kwr, kbr, kw1, kb1, kw2, kb2 = jax.random.split(key, 7)

    x = jax.random.normal(kx, (batch, seq, d_model), dtype=jnp.float32)
    # Parameters per nn.Linear shapes, stored transposed (in_features, out_features).
    wr = jax.random.normal(kwr, (d_model, num_experts), jnp.float32) * 0.1
    br = jax.random.normal(kbr, (1, num_experts), jnp.float32) * 0.1
    w1 = jax.random.normal(kw1, (num_experts, d_model, d_ff), jnp.float32) * 0.1
    b1 = jax.random.normal(kb1, (num_experts, d_ff), jnp.float32) * 0.1
    w2 = jax.random.normal(kw2, (num_experts, d_ff, d_model), jnp.float32) * 0.1
    b2 = jax.random.normal(kb2, (num_experts, d_model), jnp.float32) * 0.1

    out, lbl = simple_moe_forward(x, wr, br, w1, b1, w2, b2)
    out = jax.block_until_ready(out)
    lbl = jax.block_until_ready(lbl)

    ref_out, ref_lbl = _reference_forward(x, wr, br, w1, b1, w2, b2)
    # bf16 MXU inputs / bf16 writeback with f32 accumulation -> few-1e-3..1e-2
    # absolute deviation vs. the all-f32 reference at these magnitudes.
    assert jnp.allclose(out, ref_out, atol=5e-2, rtol=5e-2), "output mismatch"
    assert jnp.allclose(lbl, ref_lbl, atol=1e-6), "load-balance loss mismatch"

    print("KERNEL_OK")
</pallas_src>

<mosaic_0001>
module attributes {stable_mosaic.version = 11 : i64} {
  func.func private @main(%arg0: i32) attributes {dimension_semantics = [#tpu.dimension_semantics<core_parallel>], iteration_bounds = array<i64: 2>, tpu.core_type = #tpu.core_type<sc_scalar_subcore>, window_params = []} {
    return
  }
}

module attributes {stable_mosaic.version = 11 : i64} {
  func.func private @main(%arg0: i32) attributes {dimension_semantics = [#tpu.dimension_semantics<core_parallel>], iteration_bounds = array<i64: 2>, tpu.core_type = #tpu.core_type<sc_scalar_subcore>, window_params = []} {
    return
  }
}

module attributes {stable_mosaic.version = 11 : i64} {
  func.func @_expert_tile_kernel(%arg0: i32, %arg1: memref<9xi32, #tpu.memory_space<smem>>, %arg2: memref<9xi32, #tpu.memory_space<smem>>, %arg3: memref<256x128xbf16, #tpu.memory_space<vmem>>, %arg4: memref<1x128x128xbf16, #tpu.memory_space<vmem>>, %arg5: memref<1x1x128xf32, #tpu.memory_space<vmem>>, %arg6: memref<1x128x128xbf16, #tpu.memory_space<vmem>>, %arg7: memref<1x1x128xf32, #tpu.memory_space<vmem>>, %arg8: memref<256x128xbf16, #tpu.memory_space<vmem>>) attributes {dimension_semantics = [#tpu.dimension_semantics<parallel>], iteration_bounds = array<i64: 9>, scalar_prefetch = 2 : i64, scratch_operands = 0 : i64, tpu.core_type = #tpu.core_type<tc>, window_params = [{transform_indices = @transform_0, window_bounds = array<i64: 256, 128>}, {transform_indices = @transform_1, window_bounds = array<i64: 1, 128, 128>}, {transform_indices = @transform_2, window_bounds = array<i64: 1, 1, 128>}, {transform_indices = @transform_3, window_bounds = array<i64: 1, 128, 128>}, {transform_indices = @transform_4, window_bounds = array<i64: 1, 1, 128>}, {transform_indices = @transform_5, window_bounds = array<i64: 256, 128>}]} {
    %0 = arith.index_cast %arg0 : i32 to index
    %1 = memref.load %arg2[%0] : memref<9xi32, #tpu.memory_space<smem>>
    %c0_i32 = arith.constant 0 : i32
    %2 = arith.cmpi sgt, %1, %c0_i32 : i32
    %3 = arith.extui %2 : i1 to i32
    %c0_i32_0 = arith.constant 0 : i32
    %4 = arith.cmpi ne, %3, %c0_i32_0 : i32
    scf.if %4 {
      %c0 = arith.constant 0 : index
      %c0_3 = arith.constant 0 : index
      %10 = vector.load %arg3[%c0, %c0_3] : memref<256x128xbf16, #tpu.memory_space<vmem>>, vector<256x128xbf16>
      %cst = arith.constant 0.000000e+00 : f32
      %11 = vector.broadcast %cst : f32 to vector<256x128xf32>
      %c0_4 = arith.constant 0 : index
      %c0_5 = arith.constant 0 : index
      %c0_6 = arith.constant 0 : index
      %12 = vector.load %arg4[%c0_4, %c0_5, %c0_6] : memref<1x128x128xbf16, #tpu.memory_space<vmem>>, vector<1x128x128xbf16>
      %13 = vector.shape_cast %12 : vector<1x128x128xbf16> to vector<128x128xbf16>
      %cst_7 = arith.constant dense<0.000000e+00> : vector<256x128xf32>
      %14 = tpu.matmul %10, %13, %cst_7 {dimension_numbers = #tpu.dot_dimension_numbers<[1], [0], [0], [1], [0, 0, 1, 1], [], []>} : vector<256x128xbf16>, vector<128x128xbf16>, vector<256x128xf32> -> vector<256x128xf32>
      %c0_8 = arith.constant 0 : index
      %c0_9 = arith.constant 0 : index
      %c0_10 = arith.constant 0 : index
      %15 = vector.load %arg5[%c0_8, %c0_9, %c0_10] : memref<1x1x128xf32, #tpu.memory_space<vmem>>, vector<1x1x128xf32>
      %16 = vector.shape_cast %15 : vector<1x1x128xf32> to vector<1x128xf32>
      %17 = vector.broadcast %16 : vector<1x128xf32> to vector<256x128xf32>
      %18 = arith.addf %14, %17 : vector<256x128xf32>
      %cst_11 = arith.constant 0.000000e+00 : f32
      %19 = vector.broadcast %cst_11 : f32 to vector<256x128xf32>
      %20 = arith.maximumf %18, %19 : vector<256x128xf32>
      %21 = arith.truncf %20 : vector<256x128xf32> to vector<256x128xbf16>
      %c0_12 = arith.constant 0 : index
      %c0_13 = arith.constant 0 : index
      %c0_14 = arith.constant 0 : index
      %22 = vector.load %arg6[%c0_12, %c0_13, %c0_14] : memref<1x128x128xbf16, #tpu.memory_space<vmem>>, vector<1x128x128xbf16>
      %23 = vector.shape_cast %22 : vector<1x128x128xbf16> to vector<128x128xbf16>
      %cst_15 = arith.constant dense<0.000000e+00> : vector<256x128xf32>
      %24 = tpu.matmul %21, %23, %cst_15 {dimension_numbers = #tpu.dot_dimension_numbers<[1], [0], [0], [1], [0, 0, 1, 1], [], []>} : vector<256x128xbf16>, vector<128x128xbf16>, vector<256x128xf32> -> vector<256x128xf32>
      %25 = arith.addf %11, %24 : vector<256x128xf32>
      %c0_16 = arith.constant 0 : index
      %c0_17 = arith.constant 0 : index
      %c0_18 = arith.constant 0 : index
      %26 = vector.load %arg7[%c0_16, %c0_17, %c0_18] : memref<1x1x128xf32, #tpu.memory_space<vmem>>, vector<1x1x128xf32>
      %27 = vector.shape_cast %26 : vector<1x1x128xf32> to vector<1x128xf32>
      %28 = vector.broadcast %27 : vector<1x128xf32> to vector<256x128xf32>
      %29 = arith.addf %25, %28 : vector<256x128xf32>
      %30 = arith.truncf %29 : vector<256x128xf32> to vector<256x128xbf16>
      %c0_19 = arith.constant 0 : index
      %c0_20 = arith.constant 0 : index
      %31 = vector.load %arg8[%c0_19, %c0_20] : memref<256x128xbf16, #tpu.memory_space<vmem>>, vector<256x128xbf16>
      tpu.vector_store %arg8[%c0_19, %c0_20], %30 {strides = array<i32>} : memref<256x128xbf16, #tpu.memory_space<vmem>>, vector<256x128xbf16>,
    } else {
    }
    %5 = arith.index_cast %arg0 : i32 to index
    %6 = memref.load %arg2[%5] : memref<9xi32, #tpu.memory_space<smem>>
    %c0_i32_1 = arith.constant 0 : i32
    %7 = arith.cmpi eq, %6, %c0_i32_1 : i32
    %8 = arith.extui %7 : i1 to i32
    %c0_i32_2 = arith.constant 0 : i32
    %9 = arith.cmpi ne, %8, %c0_i32_2 : i32
    scf.if %9 {
      %cst = arith.constant 0.000000e+00 : bf16
      %10 = vector.broadcast %cst : bf16 to vector<256x128xbf16>
      %c0 = arith.constant 0 : index
      %c0_3 = arith.constant 0 : index
      %11 = vector.load %arg8[%c0, %c0_3] : memref<256x128xbf16, #tpu.memory_space<vmem>>, vector<256x128xbf16>
      tpu.vector_store %arg8[%c0, %c0_3], %10 {strides = array<i32>} : memref<256x128xbf16, #tpu.memory_space<vmem>>, vector<256x128xbf16>,
    } else {
    }
    return
  }
  func.func @transform_0(%arg0: i32, %arg1: memref<9xi32, #tpu.memory_space<smem>>, %arg2: memref<9xi32, #tpu.memory_space<smem>>) -> (i32, i32) {
    %c0_i32 = arith.constant 0 : i32
    %c0_i32_0 = arith.constant 0 : i32
    return %arg0, %c0_i32 : i32, i32
  }
  func.func @transform_1(%arg0: i32, %arg1: memref<9xi32, #tpu.memory_space<smem>>, %arg2: memref<9xi32, #tpu.memory_space<smem>>) -> (i32, i32, i32) {
    %0 = arith.index_cast %arg0 : i32 to index
    %1 = memref.load %arg1[%0] : memref<9xi32, #tpu.memory_space<smem>>
    %c0_i32 = arith.constant 0 : i32
    %c0_i32_0 = arith.constant 0 : i32
    %c0_i32_1 = arith.constant 0 : i32
    return %1, %c0_i32, %c0_i32_0 : i32, i32, i32
  }
  func.func @transform_2(%arg0: i32, %arg1: memref<9xi32, #tpu.memory_space<smem>>, %arg2: memref<9xi32, #tpu.memory_space<smem>>) -> (i32, i32, i32) {
    %0 = arith.index_cast %arg0 : i32 to index
    %1 = memref.load %arg1[%0] : memref<9xi32, #tpu.memory_space<smem>>
    %c0_i32 = arith.constant 0 : i32
    %c0_i32_0 = arith.constant 0 : i32
    %c0_i32_1 = arith.constant 0 : i32
    return %1, %c0_i32, %c0_i32_0 : i32, i32, i32
  }
  func.func @transform_3(%arg0: i32, %arg1: memref<9xi32, #tpu.memory_space<smem>>, %arg2: memref<9xi32, #tpu.memory_space<smem>>) -> (i32, i32, i32) {
    %0 = arith.index_cast %arg0 : i32 to index
    %1 = memref.load %arg1[%0] : memref<9xi32, #tpu.memory_space<smem>>
    %c0_i32 = arith.constant 0 : i32
    %c0_i32_0 = arith.constant 0 : i32
    %c0_i32_1 = arith.constant 0 : i32
    return %1, %c0_i32, %c0_i32_0 : i32, i32, i32
  }
  func.func @transform_4(%arg0: i32, %arg1: memref<9xi32, #tpu.memory_space<smem>>, %arg2: memref<9xi32, #tpu.memory_space<smem>>) -> (i32, i32, i32) {
    %0 = arith.index_cast %arg0 : i32 to index
    %1 = memref.load %arg1[%0] : memref<9xi32, #tpu.memory_space<smem>>
    %c0_i32 = arith.constant 0 : i32
    %c0_i32_0 = arith.constant 0 : i32
    %c0_i32_1 = arith.constant 0 : i32
    return %1, %c0_i32, %c0_i32_0 : i32, i32, i32
  }
  func.func @transform_5(%arg0: i32, %arg1: memref<9xi32, #tpu.memory_space<smem>>, %arg2: memref<9xi32, #tpu.memory_space<smem>>) -> (i32, i32) {
    %c0_i32 = arith.constant 0 : i32
    %c0_i32_0 = arith.constant 0 : i32
    return %arg0, %c0_i32 : i32, i32
  }
}

</mosaic_0001>

<bundles_post_ra>
// kernel: custom-call.18
= control target key start
LH: loop header
LB: loop body
LE: loop exit
PB: predicated region body
PF: predicated region fallthrough
CT: control target
= control target key end

     0   :  { %s6_s0 = inlined_call_operand.hbm [shape: bf16[16,32], index: 0, kind: output, shape index: {}]  }

// kernel: custom-call
= control target key start
LH: loop header
LB: loop body
LE: loop exit
PB: predicated region body
PF: predicated region fallthrough
CT: control target
= control target key end

     0   :  { %s6_s0 = inlined_call_operand.vmem [shape: u32[9], index: 0, kind: output, shape index: {}]  }

// kernel: simple_moe_forward.1
= control target key start
LH: loop header
LB: loop body
LE: loop exit
PB: predicated region body
PF: predicated region fallthrough
CT: control target
= control target key end

     0   :  { %s3203_s0 = inlined_call_operand.hbm [shape: s32[9], index: 0, kind: input, shape index: {}]   ;;  %s3204_s2 = inlined_call_operand.hbm [shape: bf16[2304,128], index: 2, kind: input, shape index: {}]   ;;  %s3205_s3 = inlined_call_operand.hbm [shape: bf16[8,128,128], index: 3, kind: input, shape index: {}]   ;;  %s3206_s4 = inlined_call_operand.hbm [shape: f32[8,1,128], index: 4, kind: input, shape index: {}]   ;;  %s3207_s5 = inlined_call_operand.hbm [shape: bf16[8,128,128], index: 5, kind: input, shape index: {}]   ;;  %s3208_s6 = inlined_call_operand.hbm [shape: f32[8,1,128], index: 6, kind: input, shape index: {}]   ;;  %s3209_s7 = inlined_call_operand.hbm [shape: bf16[2304,128], index: 7, kind: output, shape index: {}]   ;;  %s3210_s1 = inlined_call_operand.hbm [shape: s32[9], index: 1, kind: input, shape index: {}]  }
   0x1   :  { %3238 = sst [smem:[#allocation42_spill]] %s3204_s2  ;;  %s2005_s26 = scalar_lea.hbm %s3203_s0, 16 }
   0x2   :  { %3239 = sst [smem:[#allocation43_spill]] %s3205_s3  ;;  %p2006_p0 = scmp.ne.s32.totalorder %s3203_s0, %s2005_s26 }
   0x3   :  { %3240 = sst [smem:[#allocation44_spill]] %s3206_s4  ;;  %p2009_p1 = scmp.lt.u32.totalorder %s2005_s26, %s3203_s0 }
   0x4   :  { %3241 = sst [smem:[#allocation45_spill]] %s3207_s5 }
   0x5   :  { %3242 = sst [smem:[#allocation46_spill]] %s3208_s6  ;;  %p2011_p2 = pnand %p2009_p1, %p2006_p0 }
   0x6   :  { %3243 = sst [smem:[#allocation47_spill]] %s3209_s7 }
   0x7   :  { %2014 = shalt.err (!%p2011_p2)  }
   0x8   :  { %s2357_s8 = smov [#allocation3]   ;;  %s2015_s13 = scalar_lea.hbm %s3210_s1, 16 }
   0x9   :  { %13 = dma.hbm_to_smem %s3203_s0, 16, %s2357_s8, [#allocation2] }
   0xa   :  { %p2016_p3 = scmp.ne.s32.totalorder %s3210_s1, %s2015_s13  ;;  %p2019_p4 = scmp.lt.u32.totalorder %s2015_s13, %s3210_s1 }
   0xc   :  { %p2021_p5 = pnand %p2019_p4, %p2016_p3 }
   0xe   :  { %2024 = shalt.err (!%p2021_p5)  }
   0xf   :  { %s2358_s18 = smov [#allocation4]  }
  0x10   :  { %15 = dma.hbm_to_smem %s3210_s1, 16, %s2358_s18, [#allocation2] }
  0x11   :  { %2267 = dma.done.wait [#allocation2], 32 }
  0x12   :  { %2268 = vsyncadd [#allocation2], 4294967264 }
  0x13   :  { %17 = sfence }
  0x14   :  { %18 = vsyncpa [#allocation6], 0 }
  0x15   :  { %20 = vsyncpa [#allocation6 + $0x1], 0 }
  0x16   :  { %21 = vsyncpa [#allocation9], 0 }
  0x17   :  { %23 = vsyncpa [#allocation9 + $0x1], 0 }
  0x18   :  { %24 = vsyncpa [#allocation12], 0 }
  0x19   :  { %26 = vsyncpa [#allocation12 + $0x1], 0 }
  0x1a   :  { %27 = vsyncpa [#allocation7], 0 }
  0x1b   :  { %29 = vsyncpa [#allocation7 + $0x1], 0  ;;  %s2434_s0 = smov 0   ;;  %s2436_s21 = smov 0  }
  0x1c   :  { %s2438_s22 = smov 0   ;;  %s2440_s23 = smov 0  }
  0x1d   :  { %s2442_s1 = smov 0   ;;  %s2444_s24 = smov 0  }
  0x1e   :  { %s2446_s25 = smov 0   ;;  %s2448_s26 = smov 0  }
  0x1f   :  { %s2450_s27 = smov 0   ;;  %s2452_s28 = smov 0  }
  0x20   :  { %s2454_s29 = smov 0   ;;  %s2456_s30 = smov 0  }
  0x21   :  { %s2458_s8 = smov 0   ;;  %s2460_s9 = smov 0  }
  0x22   :  { %s2462_s10 = smov 0   ;;  %s2464_s11 = smov 0  }
  0x23 LB: > { %3244 = sst [smem:[#allocation30_spill]] %s2315_s24  ;;  %s2513_s12 = sadd.s32 4294967295, %s2355_s11   ;;  %s2355_s11 = sphi %s2464_s11, %s3339_s11   ;;  %s2351_s10 = sphi %s2462_s10, %s3338_s10   ;;  %s2347_s9 = sphi %s2460_s9, %s3337_s9   ;;  %s2343_s8 = sphi %s2458_s8, %s3336_s8   ;;  %s2339_s30 = sphi %s2456_s30, %s3325_s30   ;;  %s2335_s29 = sphi %s2454_s29, %s3324_s29   ;;  %s2331_s28 = sphi %s2452_s28, %s3335_s28   ;;  %s2327_s27 = sphi %s2450_s27, %s3322_s27   ;;  %s2323_s26 = sphi %s2448_s26, %s3334_s26   ;;  %s2319_s25 = sphi %s2446_s25, %s3333_s25   ;;  %s2315_s24 = sphi %s2444_s24, %s3320_s24   ;;  %s2311_s1 = sphi %s2442_s1, %s3332_s1   ;;  %s2307_s23 = sphi %s2440_s23, %s3331_s23   ;;  %s2303_s22 = sphi %s2438_s22, %s3330_s22   ;;  %s2299_s21 = sphi %s2436_s21, %s3329_s21   ;;  %s2295_s0 = sphi %s2434_s0, %s3328_s0  }
  0x24   : > { %3245 = sst [smem:[#allocation31_spill]] %s2327_s27  ;;  %s2516_s13 = sadd.s32 1, %s2355_s11  }
  0x25   : > { %3246 = sst [smem:[#allocation32_spill]] %s2335_s29  ;;  %p3221_p6 = scmp.eq.s32.totalorder %s2355_s11, 0 }
  0x26   : > { %3247 = sst [smem:[#allocation33_spill]] %s2339_s30  ;;  %p3220_p7 = scmp.eq.s32.totalorder %s2513_s12, 0 }
  0x27   : > { %3248 = sst [smem:[#allocation34_spill]] %s2351_s10  ;;  %s70_s16 = sadd.s32 1, %s2339_s30 }
  0x28   : > { %s65_s14 = sld [smem:[#allocation3 + %s2355_s11]]  ;;  %p77_p8 = scmp.ne.s32.totalorder %s2339_s30, %s2335_s29 }
  0x29   : > { %s66_s15 = sld [smem:[#allocation3 + %s2516_s13]]  ;;  %p83_p9 = scmp.ne.s32.totalorder %s2335_s29, %s2331_s28 }
  0x2a   : > { %p2528_p10 = por %p77_p8, %p3221_p6  ;;  %p3219_p11 = scmp.lt.s32.totalorder %s2355_s11, 9 }
  0x2b   : > { %p2535_p12 = por %p83_p9, %p3220_p7  ;;  %s240_s28 = sand.u32 1, %s2339_s30  }
  0x2c   : > { %s1427_s7 = sshll.u32 %s240_s28, 6  ;;  %p2545_p0 = pnand %p3219_p11, %p2528_p10 }
  0x2d   : > { %s3250_s18 = scalar_select %p2535_p12, 1, 0 }
  0x2e   : > { %s1789_s4 = scalar_select %p2528_p10, [#allocation3], [#allocation15] }
  0x2f   : > { %3251 = sst [smem:[#allocation35_spill]] %s3250_s18  ;;  %s67_s20 = ssub.s32 %s65_s14, %s66_s15 }
  0x30   : > { %p68_p13 = scmp.eq.s32.totalorder %s67_s20, 0  ;;  %s3341_s4 = smov (!%p3219_p11, %s1789_s4), [#allocation19] }
  0x31   : > { %s1790_s14 = scalar_select %p2528_p10, %s2355_s11, 0 }
  0x32   : > { %s2550_s6 = scalar_select %p68_p13, %s2339_s30, %s70_s16  }
  0x33   : > { %s3343_s14 = smov (!%p3219_p11, %s1790_s14), 0  ;;  %s242_s15 = scalar_lea.vmem [#allocation8], %s1427_s7 }
  0x34   : > { %3253 = sst [smem:[#allocation36_spill]] %s2550_s6  ;;  %s250_s20 = sshll.u32 %s242_s15, 4  ;;  %s2562_s20 = int_to_ptr.vmem [resolvable:$true] %s250_s20 }
  0x35   : > { %p1435_p1 = scmp.ge.s32.totalorder %s2355_s11, 1  ;;  %s243_s28 = sld [smem:[%s3341_s4 + %s3343_s14]] }
  0x36   : > { %p316_p2 = scmp.lt.s32.totalorder %s2355_s11, 10  ;;  %s2570_s17 = sld [smem:[#allocation3 + %s2355_s11]] }
  0x37   : > { %s2573_s19 = sld [smem:[#allocation3 + %s2516_s13]]  ;;  %s3257_s4 = sand.u32 1, %s2355_s11  }
  0x38   : > { %p2565_p3 = pnand %p1435_p1, %p316_p2  ;;  %s3256_s3 = sld [smem:[#allocation43_spill]] }
  0x39   : > { %s2585_s14 = scalar_lea.sflag [#allocation9], %s3257_s4  ;;  %p2027_p8 = pneg %p2545_p0 }
  0x3a   : > { %s3254_s16 = scalar_select %p2565_p3, 1, 0 }
  0x3b   : > { %s1514_s6 = sshll.u32 %s243_s28, 10 }
  0x3c   : > { %3255 = sst [smem:[#allocation37_spill]] %s3254_s16 }
  0x3e   : > { %s2579_s15 = scalar_lea.hbm %s3256_s3, %s1514_s6  ;;  %s2030_s6 = scalar_lea.hbm %s3256_s3, 8192 }
  0x3f   : > { %s2025_s16 = scalar_lea.hbm %s2579_s15, 1024  ;;  %p2031_p13 = scmp.lt.u32.totalorder %s2579_s15, %s3256_s3 }
  0x40   : > { %p2026_p5 = scmp.ne.s32.totalorder %s2579_s15, %s2025_s16  ;;  %p2032_p1 = scmp.lt.u32.totalorder %s2030_s6, %s2025_s16 }
  0x41   : > { %p2034_p11 = scmp.lt.u32.totalorder %s2025_s16, %s2579_s15 }
  0x42   : > { %p2028_p9 = pnand %p2027_p8, %p2026_p5  ;;  %p2033_p2 = por %p2032_p1, %p2031_p13 }
  0x44   : > { %p2029_p10 = pneg %p2028_p9  ;;  %p2035_p7 = por %p2034_p11, %p2033_p2 }
  0x46   : > { %p2036_p4 = pnand %p2035_p7, %p2029_p10 }
  0x48   : > { %2039 = shalt.err (!%p2036_p4)
}
  0x49   : > { %s2040_s4 = scalar_lea.vmem %s2562_s20, 1024  ;;  %s2359_s28 = smov [#allocation8]  }
  0x4a   : > { %p2041_p5 = scmp.ne.s32.totalorder %s2562_s20, %s2040_s4  ;;  %s2045_s18 = sshll.u32 %s2359_s28, 4  ;;  %s2046_s18 = int_to_ptr.vmem [resolvable:$false] %s2045_s18 }
  0x4b   : > { %s2047_s30 = scalar_lea.vmem %s2046_s18, 2048  ;;  %p2048_p12 = scmp.lt.s32.totalorder %s2562_s20, %s2046_s18 }
  0x4c   : > { %p2043_p9 = pnand %p2041_p5, %p2027_p8  ;;  %p2049_p13 = scmp.lt.s32.totalorder %s2047_s30, %s2040_s4 }
  0x4e   : > { %p2044_p6 = pneg %p2043_p9  ;;  %p2050_p1 = por %p2049_p13, %p2048_p12 }
  0x50   : > { %p2051_p11 = pnand %p2050_p1, %p2044_p6 }
  0x52   : > { %2054 = shalt.err (!%p2051_p11)
}
  0x53   : > { %s3223_s16 = smov 64   ;;  %s3225_s6 = smov 4  }
  0x54   : > { %1816 = dma.hbm_to_vmem [thread:$0]  (!%p2545_p0), %s2579_s15, 1024, %s2562_s20, %s2585_s14, %s3223_s16, %s3223_s16, %s3225_s6  }
  0x55   : > { %p3258_p6 = scmp.eq.s32.totalorder %s2355_s11, 0  ;;  %p3259_p7 = scmp.ne.s32.totalorder %s2315_s24, %s2311_s1 }
  0x56   : > { %p139_p4 = scmp.ne.s32.totalorder %s2311_s1, %s2307_s23  ;;  %s280_s7 = sand.u32 1, %s2315_s24  }
  0x57   : > { %p135_p12 = por %p3259_p7, %p3258_p6  ;;  %s123_s4 = ssub.s32 %s2570_s17, %s2573_s19 }
  0x58   : > { %p3260_p8 = scmp.eq.s32.totalorder %s2513_s12, 0  ;;  %p124_p2 = scmp.eq.s32.totalorder %s123_s4, 0 }
  0x59   : > { %s1431_s29 = sshll.u32 %s280_s7, 6  ;;  %p3263_p5 = scmp.lt.s32.totalorder %s2355_s11, 9 }
  0x5a   : > { %p2628_p10 = por %p139_p4, %p3260_p8  ;;  %s3265_s23 = sadd.s32 1, %s2315_s24 }
  0x5b   : > { %p2634_p0 = pnand %p3263_p5, %p135_p12  ;;  %p3267_p9 = pmov %p3263_p5 }
  0x5c   : > { %s3261_s28 = scalar_select %p2628_p10, 1, 0 }
  0x5d   : > { %s2641_s15 = scalar_select %p124_p2, %s2315_s24, %s3265_s23  }
  0x5e   : > { %3262 = sst [smem:[#allocation38_spill]] %s3261_s28  ;;  %p3268_p13 = pmov %p3263_p5 }
  0x5f   : > { %3266 = sst [smem:[#allocation39_spill]] %s2641_s15  ;;  %s282_s18 = scalar_lea.vmem [#allocation11], %s1431_s29 }
  0x60   : > { %s1795_s19 = scalar_select %p135_p12, [#allocation3], [#allocation17] }
  0x61   : > { %s1796_s17 = scalar_select %p135_p12, %s2355_s11, 0 }
  0x62   : > { %s3345_s19 = smov (!%p3267_p9, %s1795_s19), [#allocation21]  ;;  %s290_s30 = sshll.u32 %s282_s18, 4  ;;  %s2648_s30 = int_to_ptr.vmem [resolvable:$true] %s290_s30 }
  0x63   : > { %s3347_s17 = smov (!%p3268_p13, %s1796_s17), 0  ;;  %s1421_s4 = sadd.s32 4294967294, %s2355_s11  }
  0x64   : > { %s283_s7 = sld [smem:[%s3345_s19 + %s3347_s17]]  ;;  %s39_s16 = ssub.s32 %s2355_s11, %s2516_s13 }
  0x65   : > { %p2653_p1 = scmp.eq.s32.totalorder %s39_s16, 0  ;;  %s42_s6 = sadd.s32 1, %s2351_s10 }
  0x66   : > { %s3270_s5 = sld [smem:[#allocation45_spill]]  ;;  %s3271_s29 = sand.u32 1, %s2355_s11  }
  0x67   : > { %s2669_s19 = scalar_lea.sflag [#allocation12], %s3271_s29  ;;  %p2057_p12 = pneg %p2634_p0 }
  0x6a   : > { %s1515_s3 = sshll.u32 %s283_s7, 10 }
  0x6c   : > { %s2663_s28 = scalar_lea.hbm %s3270_s5, %s1515_s3  ;;  %s2060_s3 = scalar_lea.hbm %s3270_s5, 8192 }
  0x6d   : > { %s2055_s16 = scalar_lea.hbm %s2663_s28, 1024  ;;  %p2061_p2 = scmp.lt.u32.totalorder %s2663_s28, %s3270_s5 }
  0x6e   : > { %p2056_p7 = scmp.ne.s32.totalorder %s2663_s28, %s2055_s16  ;;  %p2062_p5 = scmp.lt.u32.totalorder %s2060_s3, %s2055_s16 }
  0x6f   : > { %p2064_p13 = scmp.lt.u32.totalorder %s2055_s16, %s2663_s28 }
  0x70   : > { %p2058_p4 = pnand %p2057_p12, %p2056_p7  ;;  %p2063_p9 = por %p2062_p5, %p2061_p2 }
  0x72   : > { %p2059_p8 = pneg %p2058_p4  ;;  %p2065_p6 = por %p2064_p13, %p2063_p9 }
  0x74   : > { %p2066_p11 = pnand %p2065_p6, %p2059_p8 }
  0x76   : > { %2069 = shalt.err (!%p2066_p11)
}
  0x77   : > { %s2070_s7 = scalar_lea.vmem %s2648_s30, 1024  ;;  %s2362_s29 = smov [#allocation11]  }
  0x78   : > { %p2071_p7 = scmp.ne.s32.totalorder %s2648_s30, %s2070_s7  ;;  %s2075_s17 = sshll.u32 %s2362_s29, 4  ;;  %s2076_s17 = int_to_ptr.vmem [resolvable:$false] %s2075_s17 }
  0x79   : > { %s2077_s24 = scalar_lea.vmem %s2076_s17, 2048  ;;  %p2078_p3 = scmp.lt.s32.totalorder %s2648_s30, %s2076_s17 }
  0x7a   : > { %p2073_p4 = pnand %p2071_p7, %p2057_p12  ;;  %p2079_p2 = scmp.lt.s32.totalorder %s2077_s24, %s2070_s7 }
  0x7c   : > { %p2074_p10 = pneg %p2073_p4  ;;  %p2080_p5 = por %p2079_p2, %p2078_p3 }
  0x7e   : > { %p2081_p9 = pnand %p2080_p5, %p2074_p10 }
  0x80   : > { %2084 = shalt.err (!%p2081_p9)
}
  0x81   : > { %s3272_s16 = smov 4   ;;  %s3273_s3 = smov 64  }
  0x82   : > { %1826 = dma.hbm_to_vmem [thread:$0]  (!%p2634_p0), %s2663_s28, 1024, %s2648_s30, %s2669_s19, %s3273_s3, %s3273_s3, %s3272_s16  }
  0x83   : > { %s2705_s20 = scalar_select %p2653_p1, %s2351_s10, %s42_s6  }
  0x84   : > { %p3275_p3 = scmp.ne.s32.totalorder %s2351_s10, %s2347_s9  ;;  %p3276_p10 = scmp.eq.s32.totalorder %s2355_s11, 0 }
  0x85   : > { %3274 = sst [smem:[#allocation40_spill]] %s2705_s20  ;;  %p3277_p6 = scmp.ne.s32.totalorder %s2347_s9, %s2343_s8 }
  0x86   : > { %p51_p11 = por %p3276_p10, %p3275_p3  ;;  %p3278_p12 = scmp.eq.s32.totalorder %s2513_s12, 0 }
  0x87   : > { %p191_p13 = scmp.eq.s32.totalorder %s2513_s12, 8  ;;  %p197_p7 = scmp.eq.s32.totalorder %s1421_s4, 8 }
  0x88   : > { %p2717_p8 = por %p3278_p12, %p3277_p6  ;;  %s217_s18 = sand.u32 1, %s2351_s10  }
  0x89   : > { %s1513_s7 = sshll.u32 %s2355_s11, 11  ;;  %p3280_p4 = pmov %p3275_p3 }
  0x8a   : > { %s3279_s15 = scalar_select %p2717_p8, 1, 0 }
  0x8b   : > { %p2729_p0 = por %p191_p13, %p3280_p4  ;;  %p3282_p1 = pmov %p3277_p6 }
  0x8c   : > { %s1424_s30 = sshll.u32 %s217_s18, 7  ;;  %s3284_s2 = sld [smem:[#allocation42_spill]] }
  0x8d   : > { %s3281_s28 = scalar_select %p2729_p0, 1, 0 }
  0x8e   : > { %p2736_p2 = por %p197_p7, %p3282_p1  ;;  %s221_s4 = scalar_lea.vmem [#allocation5], %s1424_s30 }
  0x8f   : > { %s228_s24 = sshll.u32 %s221_s4, 4  ;;  %p3285_p5 = scmp.lt.s32.totalorder %s2355_s11, 9  ;;  %s2751_s24 = int_to_ptr.vmem [resolvable:$true] %s228_s24 }
  0x90   : > { %s3283_s6 = scalar_select %p2736_p2, 1, 0 }
  0x91   : > { %p2747_p9 = pnand %p3285_p5, %p51_p11  ;;  %s2753_s20 = scalar_lea.sflag [#allocation6], %s217_s18 }
  0x92   : > { %s2743_s17 = scalar_lea.hbm %s3284_s2, %s1513_s7  ;;  %s2090_s29 = scalar_lea.hbm %s3284_s2, 18432 }
  0x93   : > { %s2085_s23 = scalar_lea.hbm %s2743_s17, 2048  ;;  %p2087_p10 = pneg %p2747_p9 }
  0x94   : > { %p2086_p3 = scmp.ne.s32.totalorder %s2743_s17, %s2085_s23  ;;  %p2091_p11 = scmp.lt.u32.totalorder %s2743_s17, %s3284_s2 }
  0x95   : > { %p2092_p13 = scmp.lt.u32.totalorder %s2090_s29, %s2085_s23  ;;  %p2094_p4 = scmp.lt.u32.totalorder %s2085_s23, %s2743_s17 }
  0x96   : > { %p2088_p6 = pnand %p2087_p10, %p2086_p3 }
  0x97   : > { %p2093_p7 = por %p2092_p13, %p2091_p11 }
  0x98   : > { %p2089_p12 = pneg %p2088_p6 }
  0x99   : > { %p2095_p1 = por %p2094_p4, %p2093_p7 }
  0x9b   : > { %p2096_p5 = pnand %p2095_p1, %p2089_p12 }
  0x9d   : > { %2099 = shalt.err (!%p2096_p5)
}
  0x9e   : > { %s2100_s18 = scalar_lea.vmem %s2751_s24, 2048  ;;  %s2363_s7 = smov [#allocation5]  }
  0x9f   : > { %p2101_p3 = scmp.ne.s32.totalorder %s2751_s24, %s2100_s18  ;;  %s2105_s30 = sshll.u32 %s2363_s7, 4  ;;  %s2106_s30 = int_to_ptr.vmem [resolvable:$false] %s2105_s30 }
  0xa0   : > { %s2107_s10 = scalar_lea.vmem %s2106_s30, 4096  ;;  %p2108_p0 = scmp.lt.s32.totalorder %s2751_s24, %s2106_s30 }
  0xa1   : > { %p2103_p6 = pnand %p2101_p3, %p2087_p10  ;;  %p2109_p11 = scmp.lt.s32.totalorder %s2107_s10, %s2100_s18 }
  0xa3   : > { %p2104_p2 = pneg %p2103_p6  ;;  %p2110_p13 = por %p2109_p11, %p2108_p0 }
  0xa5   : > { %p2111_p7 = pnand %p2110_p13, %p2104_p2 }
  0xa7   : > { %2114 = shalt.err (!%p2111_p7)
}
  0xa8   : > { %1811 = dma.hbm_to_vmem [thread:$0]  (!%p2747_p9), %s2743_s17, 2048, %s2751_s24, %s2753_s20, %s3273_s3, %s3273_s3, %s3272_s16  }
  0xa9   : > { %s93_s5 = sld [smem:[#allocation3 + %s2355_s11]]  ;;  %p105_p0 = scmp.ne.s32.totalorder %s2327_s27, %s2323_s26 }
  0xaa   : > { %s94_s23 = sld [smem:[#allocation3 + %s2516_s13]]  ;;  %p111_p2 = scmp.ne.s32.totalorder %s2323_s26, %s2319_s25 }
  0xab   : > { %s262_s29 = sand.u32 1, %s2327_s27   ;;  %p3287_p10 = scmp.eq.s32.totalorder %s2355_s11, 0 }
  0xac   : > { %s98_s4 = sadd.s32 1, %s2327_s27  ;;  %p3288_p4 = scmp.eq.s32.totalorder %s2513_s12, 0 }
  0xad   : > { %p107_p12 = por %p105_p0, %p3287_p10  ;;  %s263_s20 = scalar_lea.vmem [#allocation10], %s262_s29 }
  0xae   : > { %p2796_p1 = por %p111_p2, %p3288_p4  ;;  %s271_s25 = sshll.u32 %s263_s20, 4  ;;  %s2822_s25 = int_to_ptr.vmem [resolvable:$true] %s271_s25 }
  0xaf   : > { %s1792_s16 = scalar_select %p107_p12, [#allocation3], [#allocation16] }
  0xb0   : > { %s3289_s18 = scalar_select %p2796_p1, 1, 0 }
  0xb1   : > { %s95_s3 = ssub.s32 %s93_s5, %s94_s23  ;;  %p3290_p5 = scmp.lt.s32.totalorder %s2355_s11, 9 }
  0xb2   : > { %p96_p9 = scmp.eq.s32.totalorder %s95_s3, 0  ;;  %s2815_s10 = sld [smem:[#allocation3 + %s2355_s11]] }
  0xb3   : > { %p2802_p3 = pnand %p3290_p5, %p107_p12  ;;  %p3293_p6 = pmov %p3290_p5 }
  0xb4   : > { %s1793_s24 = scalar_select %p107_p12, %s2355_s11, 0 }
  0xb5   : > { %s2808_s7 = scalar_select %p96_p9, %s2327_s27, %s98_s4  }
  0xb6   : > { %s3349_s16 = smov (!%p3293_p6, %s1792_s16), [#allocation20]  ;;  %p3294_p11 = pmov %p3290_p5 }
  0xb7   : > { %3292 = sst [smem:[#allocation41_spill]] %s2808_s7  ;;  %p161_p13 = scmp.ne.s32.totalorder %s2303_s22, %s2299_s21 }
  0xb8   : > { %s3351_s24 = smov (!%p3294_p11, %s1793_s24), 0  ;;  %s2818_s5 = sld [smem:[#allocation3 + %s2516_s13]] }
  0xb9   : > { %s264_s30 = sld [smem:[%s3349_s16 + %s3351_s24]]  ;;  %p167_p7 = scmp.ne.s32.totalorder %s2299_s21, %s2295_s0 }
  0xba   : > { %p3295_p0 = pmov %p3287_p10  ;;  %s3297_s20 = sld [smem:[#allocation44_spill]] }
  0xbb   : > { %p3298_p10 = pmov %p3288_p4  ;;  %p2117_p9 = pneg %p2802_p3 }
  0xbc   : > { %p2828_p2 = por %p161_p13, %p3295_p0 }
  0xbd   : > { %p2839_p12 = por %p167_p7, %p3298_p10 }
  0xbf   : > { %s1430_s23 = sshll.u32 %s264_s30, 4 }
  0xc0   : > { %s2835_s2 = scalar_lea.hbm %s3297_s20, %s1430_s23  ;;  %s2120_s23 = scalar_lea.hbm %s3297_s20, 128 }
  0xc1   : > { %s3299_s16 = scalar_select %p2839_p12, 1, 0 }
  0xc2   : > { %s2115_s0 = scalar_lea.hbm %s2835_s2, 16  ;;  %p2121_p11 = scmp.lt.u32.totalorder %s2835_s2, %s3297_s20 }
  0xc3   : > { %p2116_p4 = scmp.ne.s32.totalorder %s2835_s2, %s2115_s0  ;;  %p2122_p13 = scmp.lt.u32.totalorder %s2120_s23, %s2115_s0 }
  0xc4   : > { %p2124_p0 = scmp.lt.u32.totalorder %s2115_s0, %s2835_s2 }
  0xc5   : > { %p2118_p5 = pnand %p2117_p9, %p2116_p4  ;;  %p2123_p7 = por %p2122_p13, %p2121_p11 }
  0xc7   : > { %p2119_p6 = pneg %p2118_p5  ;;  %p2125_p10 = por %p2124_p0, %p2123_p7 }
  0xc9   : > { %p2126_p12 = pnand %p2125_p10, %p2119_p6 }
  0xcb   : > { %2129 = shalt.err (!%p2126_p12)
}
  0xcc   : > { %s2130_s7 = scalar_lea.vmem %s2822_s25, 16  ;;  %s2364_s24 = smov [#allocation10]  }
  0xcd   : > { %p2131_p4 = scmp.ne.s32.totalorder %s2822_s25, %s2130_s7  ;;  %s2135_s30 = sshll.u32 %s2364_s24, 4  ;;  %s2136_s30 = int_to_ptr.vmem [resolvable:$false] %s2135_s30 }
  0xce   : > { %s2137_s4 = scalar_lea.vmem %s2136_s30, 32  ;;  %p2138_p8 = scmp.lt.s32.totalorder %s2822_s25, %s2136_s30 }
  0xcf   : > { %p2133_p5 = pnand %p2131_p4, %p2117_p9  ;;  %p2139_p11 = scmp.lt.s32.totalorder %s2137_s4, %s2130_s7 }
  0xd1   : > { %p2134_p1 = pneg %p2133_p5  ;;  %p2140_p13 = por %p2139_p11, %p2138_p8 }
  0xd3   : > { %p2141_p7 = pnand %p2140_p13, %p2134_p1 }
  0xd5   : > { %2144 = shalt.err (!%p2141_p7)
}
  0xd6   : > { %1821 = dma.hbm_to_vmem [thread:$0]  (!%p2802_p3), %s2835_s2, 16, %s2822_s25, %s2585_s14  }
  0xd7   : > { %s151_s7 = ssub.s32 %s2815_s10, %s2818_s5  ;;  %s154_s0 = sadd.s32 1, %s2303_s22 }
  0xd8   : > { %p152_p8 = scmp.eq.s32.totalorder %s151_s7, 0  ;;  %s302_s17 = sand.u32 1, %s2303_s22  }
  0xd9   : > { %s1798_s23 = scalar_select %p2828_p2, [#allocation3], [#allocation18] }
  0xda   : > { %s2876_s3 = scalar_select %p152_p8, %s2303_s22, %s154_s0  }
  0xdb   : > { %s1799_s24 = scalar_select %p2828_p2, %s2355_s11, 0 }
  0xdc   : > { %p3300_p1 = scmp.lt.s32.totalorder %s2355_s11, 9  ;;  %s303_s14 = scalar_lea.vmem [#allocation13], %s302_s17 }
  0xdd   : > { %s311_s25 = sshll.u32 %s303_s14, 4  ;;  %s3304_s7 = sld [smem:[#allocation46_spill]]  ;;  %s2893_s25 = int_to_ptr.vmem [resolvable:$true] %s311_s25 }
  0xde   : > { %s3353_s23 = smov (!%p3300_p1, %s1798_s23), [#allocation22]  ;;  %p3301_p12 = pmov %p3300_p1 }
  0xdf   : > { %p3302_p9 = pmov %p3300_p1 }
  0xe0   : > { %s3355_s24 = smov (!%p3301_p12, %s1799_s24), 0 }
  0xe1   : > { %p2889_p6 = pnand %p3302_p9, %p2828_p2  ;;  %s304_s2 = sld [smem:[%s3353_s23 + %s3355_s24]] }
  0xe3   : > { %p2147_p0 = pneg %p2889_p6  ;;  %s2150_s17 = scalar_lea.hbm %s3304_s7, 128 }
  0xe7   : > { %s1434_s10 = sshll.u32 %s304_s2, 4 }
  0xe8   : > { %s309_s0 = scalar_lea.hbm %s3304_s7, %s1434_s10 }
  0xe9   : > { %s2145_s20 = scalar_lea.hbm %s309_s0, 16  ;;  %p2151_p4 = scmp.lt.u32.totalorder %s309_s0, %s3304_s7 }
  0xea   : > { %p2146_p3 = scmp.ne.s32.totalorder %s309_s0, %s2145_s20  ;;  %p2152_p5 = scmp.lt.u32.totalorder %s2150_s17, %s2145_s20 }
  0xeb   : > { %p2154_p13 = scmp.lt.u32.totalorder %s2145_s20, %s309_s0 }
  0xec   : > { %p2148_p2 = pnand %p2147_p0, %p2146_p3  ;;  %p2153_p11 = por %p2152_p5, %p2151_p4 }
  0xee   : > { %p2149_p10 = pneg %p2148_p2  ;;  %p2155_p7 = por %p2154_p13, %p2153_p11 }
  0xf0   : > { %p2156_p8 = pnand %p2155_p7, %p2149_p10 }
  0xf2   : > { %2159 = shalt.err (!%p2156_p8)
}
  0xf3   : > { %s2160_s2 = scalar_lea.vmem %s2893_s25, 16  ;;  %s2365_s27 = smov [#allocation13]  }
  0xf4   : > { %p2161_p1 = scmp.ne.s32.totalorder %s2893_s25, %s2160_s2  ;;  %s2165_s14 = sshll.u32 %s2365_s27, 4  ;;  %s2166_s14 = int_to_ptr.vmem [resolvable:$false] %s2165_s14 }
  0xf5   : > { %s2167_s10 = scalar_lea.vmem %s2166_s14, 32  ;;  %p2168_p3 = scmp.lt.s32.totalorder %s2893_s25, %s2166_s14 }
  0xf6   : > { %p2163_p12 = pnand %p2161_p1, %p2147_p0  ;;  %p2169_p2 = scmp.lt.s32.totalorder %s2167_s10, %s2160_s2 }
  0xf8   : > { %p2164_p9 = pneg %p2163_p12  ;;  %p2170_p4 = por %p2169_p2, %p2168_p3 }
  0xfa   : > { %p2171_p5 = pnand %p2170_p4, %p2164_p9 }
  0xfc   : > { %2174 = shalt.err (!%p2171_p5)
}
  0xfd   : > { %1831 = dma.hbm_to_vmem [thread:$0]  (!%p2889_p6), %s309_s0, 16, %s2893_s25, %s2669_s19  }
  0xfe   : > { %s3305_s20 = sld [smem:[#allocation37_spill]] }
 0x104   : > { %p3306_p10 = scmp.ne.s32.totalorder %s3305_s20, 0 }
 0x105   : > { %s2922_s5 = sand.u32 (!%p3306_p10), 1, %s2347_s9   ;;  %p3307_p0 = scmp.ne.s32.totalorder (!%p3306_p10), %s3279_s15, 0 }
 0x106   : > { %320 = sbr.rel (%p3306_p10) target bundleno = 885 (0x375), region = 40  ;;  %s1436_s4 = sshll.u32 (!%p3306_p10), %s2922_s5, 7 }
 0x107   : > { %s323_s29 = scalar_lea.sflag (!%p3306_p10), [#allocation6], %s2922_s5  ;;  %s2926_s17 = scalar_lea.vmem (!%p3306_p10), [#allocation5], %s1436_s4 }
 0x10d   : > { %2270 = dma.done.wait (%p3307_p0), %s323_s29, 2048  }
 0x10e   : > { %2272 = vsyncadd (%p3307_p0), %s323_s29, 4294965248  ;;  %s3308_s19 = sld [smem:[#allocation32_spill]]  ;;  %s3309_s30 = sld [smem:[#allocation35_spill]] }
 0x10f   : > { %s331_s25 = sand.u32 1, %s2513_s12  }
 0x110   : > { %s332_s24 = scalar_lea.sflag [#allocation9], %s331_s25 }
 0x114   : > { %s333_s0 = sand.u32 1, %s3308_s19   ;;  %p3310_p6 = scmp.ne.s32.totalorder %s3309_s30, 0 }
 0x115   : > { %s1437_s23 = sshll.u32 %s333_s0, 6 }
 0x116   : > { %s2934_s2 = scalar_lea.vmem [#allocation8], %s1437_s23 }
 0x117   : > { %2274 = dma.done.wait (%p3310_p6), %s332_s24, 1024  }
 0x118   : > { %2276 = vsyncadd (%p3310_p6), %s332_s24, 4294966272  ;;  %s342_s27 = sand.u32 1, %s2323_s26   ;;  %p3311_p11 = scmp.ne.s32.totalorder %s3289_s18, 0 }
 0x119   : > { %s2941_s14 = scalar_lea.vmem [#allocation10], %s342_s27 }
 0x11a   : > { %2278 = dma.done.wait (%p3311_p11), %s332_s24, 16  }
 0x11b   : > { %2280 = vsyncadd (%p3311_p11), %s332_s24, 4294967280  ;;  %s3312_s15 = sld [smem:[#allocation38_spill]]  ;;  %s350_s10 = sand.u32 1, %s2311_s1  }
 0x11c   : > { %s1438_s20 = sshll.u32 %s350_s10, 6  ;;  %s349_s29 = scalar_lea.sflag [#allocation12], %s331_s25 }
 0x11d   : > { %s2948_s19 = scalar_lea.vmem [#allocation11], %s1438_s20 }
 0x121   : > { %p3313_p13 = scmp.ne.s32.totalorder %s3312_s15, 0 }
 0x123   : > { %2282 = dma.done.wait (%p3313_p13), %s349_s29, 1024  }
 0x124   : > { %2284 = vsyncadd (%p3313_p13), %s349_s29, 4294966272  ;;  %s359_s30 = sand.u32 1, %s2299_s21   ;;  %p3314_p7 = scmp.ne.s32.totalorder %s3299_s16, 0 }
 0x125   : > { %s2955_s0 = scalar_lea.vmem [#allocation13], %s359_s30 }
 0x126   : > { %2286 = dma.done.wait (%p3314_p7), %s349_s29, 16  }
 0x127   : > { %2288 = vsyncadd (%p3314_p7), %s349_s29, 4294967280  ;;  %s412_s18 = sld [smem:[#allocation4 + %s2513_s12]]  ;;  %s2962_s25 = scalar_lea.vmem [#allocation14], %s1436_s4 }
 0x12d   : > { %p1440_p8 = scmp.le.s32.totalorder %s412_s18, 0 }
 0x12e   : > { %v1973_v0 = vld [vmem:[%s2934_s2] sm:$0xff] (!%p1440_p8)   ;;  %v1974_v1 = vld [vmem:[%s2934_s2 + $0x8] sm:$0xff] (!%p1440_p8)   ;;  %v1975_v2 = vld [vmem:[%s2934_s2 + $0x10] sm:$0xff] (!%p1440_p8)  }
 0x12f   : > { %416 = sbr.rel (%p1440_p8) target bundleno = 833 (0x341), region = 64  ;;  %1692 = vmatprep.subr.bf16.mxu0 (!%p1440_p8), %v1973_v0  ;;  %v1976_v3 = vld [vmem:[%s2934_s2 + $0x18] sm:$0xff] (!%p1440_p8)   ;;  %v1981_v4 = vld [vmem:[%s2926_s17] sm:$0xff] (!%p1440_p8)   ;;  %v1978_v6 = vld [vmem:[%s2934_s2 + $0x28] sm:$0xff] (!%p1440_p8)  }
 0x130   : > { %1693 = vmatpush3.bf16.msra.mxu0 (!%p1440_p8), %v1973_v0  ;;  %1708 = vmatprep.mubr.bf16.mxu0 (!%p1440_p8), %v1981_v4  ;;  %v1977_v5 = vld [vmem:[%s2934_s2 + $0x20] sm:$0xff] (!%p1440_p8)   ;;  %v1979_v7 = vld [vmem:[%s2934_s2 + $0x30] sm:$0xff] (!%p1440_p8)   ;;  %v1980_v8 = vld [vmem:[%s2934_s2 + $0x38] sm:$0xff] (!%p1440_p8)  }
 0x131   : > { %1694 = vmatprep.subr.bf16.mxu0 (!%p1440_p8), %v1974_v1  ;;  %v1997_v9 = vld [vmem:[%s2948_s19] sm:$0xff] (!%p1440_p8)   ;;  %v1998_v10 = vld [vmem:[%s2948_s19 + $0x8] sm:$0xff] (!%p1440_p8)   ;;  %v1999_v11 = vld [vmem:[%s2948_s19 + $0x10] sm:$0xff] (!%p1440_p8)  }
 0x132   : > { %1740 = vmatprep.subr.bf16.mxu1 (!%p1440_p8), %v1997_v9  ;;  %v1982_v12 = vld [vmem:[%s2926_s17 + $0x8] sm:$0xff] (!%p1440_p8)   ;;  %v1983_v13 = vld [vmem:[%s2926_s17 + $0x10] sm:$0xff] (!%p1440_p8)   ;;  %v2000_v14 = vld [vmem:[%s2948_s19 + $0x18] sm:$0xff] (!%p1440_p8)  }
 0x133   : > { %1741 = vmatpush3.bf16.msra.mxu1 (!%p1440_p8), %v1997_v9  ;;  %v2001_v15 = vld [vmem:[%s2948_s19 + $0x20] sm:$0xff] (!%p1440_p8)   ;;  %v1984_v16 = vld [vmem:[%s2926_s17 + $0x18] sm:$0xff] (!%p1440_p8)   ;;  %v2002_v18 = vld [vmem:[%s2948_s19 + $0x28] sm:$0xff] (!%p1440_p8)  }
 0x134   : > { %1695 = vmatpush3.bf16.msra.mxu0 (!%p1440_p8), %v1974_v1  ;;  %1742 = vmatprep.subr.bf16.mxu1 (!%p1440_p8), %v1998_v10  ;;  %v1985_v17 = vld [vmem:[%s2926_s17 + $0x20] sm:$0xff] (!%p1440_p8)   ;;  %v1986_v19 = vld [vmem:[%s2926_s17 + $0x28] sm:$0xff] (!%p1440_p8)   ;;  %v1987_v20 = vld [vmem:[%s2926_s17 + $0x30] sm:$0xff] (!%p1440_p8)  }
 0x135   : > { %1696 = vmatprep.subr.bf16.mxu0 (!%p1440_p8), %v1975_v2  ;;  %v1988_v21 = vld [vmem:[%s2926_s17 + $0x38] sm:$0xff] (!%p1440_p8)   ;;  %v1989_v22 = vld [vmem:[%s2926_s17 + $0x40] sm:$0xff] (!%p1440_p8)   ;;  %v1990_v23 = vld [vmem:[%s2926_s17 + $0x48] sm:$0xff] (!%p1440_p8)  }
 0x136   : > { %v1991_v24 = vld [vmem:[%s2926_s17 + $0x50] sm:$0xff]   ;;  %v1992_v25 = vld [vmem:[%s2926_s17 + $0x58] sm:$0xff]   ;;  %v1993_v26 = vld [vmem:[%s2926_s17 + $0x60] sm:$0xff]  }
 0x137   : > { %1743 = vmatpush3.bf16.msra.mxu1 %v1998_v10  ;;  %v1994_v27 = vld [vmem:[%s2926_s17 + $0x68] sm:$0xff]   ;;  %v1995_v28 = vld [vmem:[%s2926_s17 + $0x70] sm:$0xff]   ;;  %v1996_v29 = vld [vmem:[%s2926_s17 + $0x78] sm:$0xff]  }
 0x138   : > { %1697 = vmatpush3.bf16.msra.mxu0 %v1975_v2  ;;  %1744 = vmatprep.subr.bf16.mxu1 %v1999_v11  ;;  %v2003_v30 = vld [vmem:[%s2948_s19 + $0x30] sm:$0xff]   ;;  %v2004_v31 = vld [vmem:[%s2948_s19 + $0x38] sm:$0xff]  }
 0x139   : > { %1698 = vmatprep.subr.bf16.mxu0 %v1976_v3  ;;  %v2997_v32 = vld [vmem:[%s2941_s14] ss:$0 sm:$0xff] }
 0x13b   : > { %1745 = vmatpush3.bf16.msra.mxu1 %v1999_v11 }
 0x13c   : > { %1699 = vmatpush3.bf16.msra.mxu0 %v1976_v3  ;;  %1746 = vmatprep.subr.bf16.mxu1 %v2000_v14 }
 0x13d   : > { %1700 = vmatprep.subr.bf16.mxu0 %v1977_v5 }
 0x13f   : > { %1747 = vmatpush3.bf16.msra.mxu1 %v2000_v14 }
 0x140   : > { %1701 = vmatpush3.bf16.msra.mxu0 %v1977_v5  ;;  %1748 = vmatprep.subr.bf16.mxu1 %v2001_v15 }
 0x141   : > { %1702 = vmatprep.subr.bf16.mxu0 %v1978_v6 }
 0x143   : > { %1749 = vmatpush3.bf16.msra.mxu1 %v2001_v15 }
 0x144   : > { %1703 = vmatpush3.bf16.msra.mxu0 %v1978_v6  ;;  %1750 = vmatprep.subr.bf16.mxu1 %v2002_v18 }
 0x145   : > { %1704 = vmatprep.subr.bf16.mxu0 %v1979_v7 }
 0x147   : > { %1751 = vmatpush3.bf16.msra.mxu1 %v2002_v18 }
 0x148   : > { %1705 = vmatpush3.bf16.msra.mxu0 %v1979_v7  ;;  %1752 = vmatprep.subr.bf16.mxu1 %v2003_v30 }
 0x149   : > { %1706 = vmatprep.subr.bf16.mxu0 %v1980_v8 }
 0x14b   : > { %1753 = vmatpush3.bf16.msra.mxu1 %v2003_v30 }
 0x14c   : > { %1707 = vmatpush3.bf16.msra.mxu0 %v1980_v8  ;;  %1754 = vmatprep.subr.bf16.mxu1 %v2004_v31 }
 0x14f   : > { %1709 = vmatmul.mubr.bf16.vlgmr.msra.gmra.mrb[0].mxu0 %v1982_v12  ;;  %1755 = vmatpush3.bf16.msra.mxu1 %v2004_v31 }
 0x150   : > { %1712 = vmatprep.mubr.bf16.mxu0 %v1983_v13 }
 0x157   : > { %1713 = vmatmul.mubr.bf16.gmra.mrb[4].mxu0 %v1984_v16 }
 0x158   : > { %1716 = vmatprep.mubr.bf16.mxu0 %v1985_v17 }
 0x15f   : > { %1717 = vmatmul.mubr.bf16.gmra.mrb[8].mxu0 %v1986_v19 }
 0x160   : > { %1720 = vmatprep.mubr.bf16.mxu0 %v1987_v20 }
 0x167   : > { %1721 = vmatmul.mubr.bf16.gmra.mrb[12].mxu0 %v1988_v21 }
 0x168   : > { %1724 = vmatprep.mubr.bf16.mxu0 %v1989_v22 }
 0x16f   : > { %1725 = vmatmul.mubr.bf16.gmra.mrb[16].mxu0 %v1990_v23 }
 0x170   : > { %1728 = vmatprep.mubr.bf16.mxu0 %v1991_v24 }
 0x177   : > { %1729 = vmatmul.mubr.bf16.gmra.mrb[20].mxu0 %v1992_v25 }
 0x178   : > { %1732 = vmatprep.mubr.bf16.mxu0 %v1993_v26 }
 0x17f   : > { %1733 = vmatmul.mubr.bf16.gmra.mrb[24].mxu0 %v1994_v27 }
 0x180   : > { %1736 = vmatprep.mubr.bf16.mxu0 %v1995_v28 }
 0x187   : > { %1737 = vmatmul.mubr.bf16.gmra.mrb[28].mxu0 %v1996_v29 }
 0x222   : > { %v1710_v33 = vpop.f32.mrb[0].mxu0 }
 0x223   : > { %v659_v34 = vadd.f32 %v1710_v33, %v2997_v32  ;;  %v650_v35 = vpop.f32.mrb[1].mxu0 }
 0x224   : > { %v651_v36 = vadd.f32 %v2997_v32, %v650_v35  ;;  %v1711_v37 = vpop.f32.mrb[2].mxu0 }
 0x225   : > { %v662_v38 = vadd.f32 %v1711_v37, %v2997_v32  ;;  %v653_v39 = vpop.f32.mrb[3].mxu0  ;;  %v779_v41 = vmax.f32 %v659_v34, 0.0 }
 0x226   : > { %v654_v40 = vadd.f32 %v2997_v32, %v653_v39  ;;  %v777_v43 = vmax.f32 %v651_v36, 0.0 }
 0x227   : > { %v780_v42 = vmax.f32 %v662_v38, 0.0 }
 0x228   : > { %v778_v44 = vmax.f32 %v654_v40, 0.0 }
 0x229   : > { %v810_v45 = vpack.c.bf16 %v780_v42, %v779_v41 }
 0x22a   : > { %v1714_v46 = vpop.f32.mrb[4].mxu0  ;;  %v809_v47 = vpack.c.bf16 %v778_v44, %v777_v43 }
 0x22b   : > { %v675_v48 = vadd.f32 %v1714_v46, %v2997_v32  ;;  %v666_v49 = vpop.f32.mrb[5].mxu0 }
 0x22c   : > { %v667_v50 = vadd.f32 %v2997_v32, %v666_v49  ;;  %v1715_v51 = vpop.f32.mrb[6].mxu0  ;;  %1756 = vmatprep.mubr.bf16.mxu1 %v809_v47 }
 0x22d   : > { %v678_v52 = vadd.f32 %v1715_v51, %v2997_v32  ;;  %v669_v53 = vpop.f32.mrb[7].mxu0  ;;  %1757 = vmatmul.mubr.bf16.vlgmr.msra.gmra.mrb[0].mxu1 %v810_v45  ;;  %v783_v55 = vmax.f32 %v675_v48, 0.0 }
 0x22e   : > { %v670_v54 = vadd.f32 %v2997_v32, %v669_v53  ;;  %v781_v57 = vmax.f32 %v667_v50, 0.0 }
 0x22f   : > { %v784_v56 = vmax.f32 %v678_v52, 0.0 }
 0x230   : > { %v782_v58 = vmax.f32 %v670_v54, 0.0 }
 0x231   : > { %v812_v59 = vpack.c.bf16 %v784_v56, %v783_v55 }
 0x232   : > { %v811_v60 = vpack.c.bf16 %v782_v58, %v781_v57  ;;  %v1718_v61 = vpop.f32.mrb[8].mxu0 }
 0x233   : > { %v691_v62 = vadd.f32 %v1718_v61, %v2997_v32  ;;  %v682_v63 = vpop.f32.mrb[9].mxu0 }
 0x234   : > { %v683_v0 = vadd.f32 %v2997_v32, %v682_v63  ;;  %v1719_v1 = vpop.f32.mrb[10].mxu0  ;;  %1760 = vmatprep.mubr.bf16.mxu1 %v811_v60 }
 0x235   : > { %v694_v2 = vadd.f32 %v1719_v1, %v2997_v32  ;;  %v685_v3 = vpop.f32.mrb[11].mxu0  ;;  %1761 = vmatmul.mubr.bf16.gmra.mrb[4].mxu1 %v812_v59  ;;  %v787_v5 = vmax.f32 %v691_v62, 0.0 }
 0x236   : > { %v686_v4 = vadd.f32 %v2997_v32, %v685_v3  ;;  %v785_v7 = vmax.f32 %v683_v0, 0.0 }
 0x237   : > { %v788_v6 = vmax.f32 %v694_v2, 0.0 }
 0x238   : > { %v786_v8 = vmax.f32 %v686_v4, 0.0 }
 0x239   : > { %v814_v9 = vpack.c.bf16 %v788_v6, %v787_v5 }
 0x23a   : > { %v813_v10 = vpack.c.bf16 %v786_v8, %v785_v7  ;;  %v1722_v11 = vpop.f32.mrb[12].mxu0 }
 0x23b   : > { %v707_v12 = vadd.f32 %v1722_v11, %v2997_v32  ;;  %v698_v13 = vpop.f32.mrb[13].mxu0 }
 0x23c   : > { %v699_v14 = vadd.f32 %v2997_v32, %v698_v13  ;;  %v1723_v15 = vpop.f32.mrb[14].mxu0  ;;  %1764 = vmatprep.mubr.bf16.mxu1 %v813_v10 }
 0x23d   : > { %v710_v16 = vadd.f32 %v1723_v15, %v2997_v32  ;;  %v701_v17 = vpop.f32.mrb[15].mxu0  ;;  %1765 = vmatmul.mubr.bf16.gmra.mrb[8].mxu1 %v814_v9  ;;  %v791_v19 = vmax.f32 %v707_v12, 0.0 }
 0x23e   : > { %v702_v18 = vadd.f32 %v2997_v32, %v701_v17  ;;  %v789_v21 = vmax.f32 %v699_v14, 0.0 }
 0x23f   : > { %v792_v20 = vmax.f32 %v710_v16, 0.0 }
 0x240   : > { %v790_v22 = vmax.f32 %v702_v18, 0.0 }
 0x241   : > { %v816_v23 = vpack.c.bf16 %v792_v20, %v791_v19  ;;  %v3032_v19 = vld [vmem:[%s2955_s0] ss:$0 sm:$0xff] }
 0x242   : > { %v815_v24 = vpack.c.bf16 %v790_v22, %v789_v21  ;;  %v1726_v25 = vpop.f32.mrb[16].mxu0 }
 0x243   : > { %v723_v26 = vadd.f32 %v1726_v25, %v2997_v32  ;;  %v714_v27 = vpop.f32.mrb[17].mxu0 }
 0x244   : > { %v715_v28 = vadd.f32 %v2997_v32, %v714_v27  ;;  %v1727_v29 = vpop.f32.mrb[18].mxu0  ;;  %1768 = vmatprep.mubr.bf16.mxu1 %v815_v24 }
 0x245   : > { %v726_v30 = vadd.f32 %v1727_v29, %v2997_v32  ;;  %v717_v31 = vpop.f32.mrb[19].mxu0  ;;  %1769 = vmatmul.mubr.bf16.gmra.mrb[12].mxu1 %v816_v23  ;;  %v795_v34 = vmax.f32 %v723_v26, 0.0 }
 0x246   : > { %v718_v33 = vadd.f32 %v2997_v32, %v717_v31  ;;  %v793_v36 = vmax.f32 %v715_v28, 0.0 }
 0x247   : > { %v796_v35 = vmax.f32 %v726_v30, 0.0 }
 0x248   : > { %v794_v37 = vmax.f32 %v718_v33, 0.0 }
 0x249   : > { %v818_v38 = vpack.c.bf16 %v796_v35, %v795_v34 }
 0x24a   : > { %v817_v39 = vpack.c.bf16 %v794_v37, %v793_v36  ;;  %v1730_v40 = vpop.f32.mrb[20].mxu0 }
 0x24b   : > { %v739_v41 = vadd.f32 %v1730_v40, %v2997_v32  ;;  %v730_v42 = vpop.f32.mrb[21].mxu0 }
 0x24c   : > { %v731_v43 = vadd.f32 %v2997_v32, %v730_v42  ;;  %v1731_v44 = vpop.f32.mrb[22].mxu0  ;;  %1772 = vmatprep.mubr.bf16.mxu1 %v817_v39 }
 0x24d   : > { %v742_v45 = vadd.f32 %v1731_v44, %v2997_v32  ;;  %v733_v46 = vpop.f32.mrb[23].mxu0  ;;  %1773 = vmatmul.mubr.bf16.gmra.mrb[16].mxu1 %v818_v38  ;;  %v799_v48 = vmax.f32 %v739_v41, 0.0 }
 0x24e   : > { %v734_v47 = vadd.f32 %v2997_v32, %v733_v46  ;;  %v797_v50 = vmax.f32 %v731_v43, 0.0 }
 0x24f   : > { %v800_v49 = vmax.f32 %v742_v45, 0.0 }
 0x250   : > { %v798_v51 = vmax.f32 %v734_v47, 0.0 }
 0x251   : > { %v820_v52 = vpack.c.bf16 %v800_v49, %v799_v48 }
 0x252   : > { %v819_v53 = vpack.c.bf16 %v798_v51, %v797_v50  ;;  %v1734_v54 = vpop.f32.mrb[24].mxu0 }
 0x253   : > { %v755_v55 = vadd.f32 %v1734_v54, %v2997_v32  ;;  %v746_v56 = vpop.f32.mrb[25].mxu0 }
 0x254   : > { %v747_v57 = vadd.f32 %v2997_v32, %v746_v56  ;;  %v1735_v58 = vpop.f32.mrb[26].mxu0  ;;  %1776 = vmatprep.mubr.bf16.mxu1 %v819_v53 }
 0x255   : > { %v758_v59 = vadd.f32 %v1735_v58, %v2997_v32  ;;  %v749_v60 = vpop.f32.mrb[27].mxu0  ;;  %1777 = vmatmul.mubr.bf16.gmra.mrb[20].mxu1 %v820_v52  ;;  %v803_v62 = vmax.f32 %v755_v55, 0.0 }
 0x256   : > { %v750_v61 = vadd.f32 %v2997_v32, %v749_v60  ;;  %v801_v0 = vmax.f32 %v747_v57, 0.0 }
 0x257   : > { %v804_v63 = vmax.f32 %v758_v59, 0.0 }
 0x258   : > { %v802_v1 = vmax.f32 %v750_v61, 0.0 }
 0x259   : > { %v822_v2 = vpack.c.bf16 %v804_v63, %v803_v62 }
 0x25a   : > { %v821_v3 = vpack.c.bf16 %v802_v1, %v801_v0  ;;  %v1738_v4 = vpop.f32.mrb[28].mxu0 }
 0x25b   : > { %v771_v5 = vadd.f32 %v1738_v4, %v2997_v32  ;;  %v762_v6 = vpop.f32.mrb[29].mxu0 }
 0x25c   : > { %v763_v7 = vadd.f32 %v2997_v32, %v762_v6  ;;  %v1739_v8 = vpop.f32.mrb[30].mxu0  ;;  %1780 = vmatprep.mubr.bf16.mxu1 %v821_v3 }
 0x25d   : > { %v774_v9 = vadd.f32 %v1739_v8, %v2997_v32  ;;  %v765_v10 = vpop.f32.mrb[31].mxu0  ;;  %1781 = vmatmul.mubr.bf16.gmra.mrb[24].mxu1 %v822_v2  ;;  %v807_v12 = vmax.f32 %v771_v5, 0.0 }
 0x25e   : > { %v766_v11 = vadd.f32 %v2997_v32, %v765_v10  ;;  %v805_v14 = vmax.f32 %v763_v7, 0.0 }
 0x25f   : > { %v808_v13 = vmax.f32 %v774_v9, 0.0 }
 0x260   : > { %v806_v15 = vmax.f32 %v766_v11, 0.0 }
 0x261   : > { %v824_v16 = vpack.c.bf16 %v808_v13, %v807_v12 }
 0x262   : > { %v823_v17 = vpack.c.bf16 %v806_v15, %v805_v14 }
 0x264   : > { %1784 = vmatprep.mubr.bf16.mxu1 %v823_v17 }
 0x265   : > { %1785 = vmatmul.mubr.bf16.gmra.mrb[28].mxu1 %v824_v16 }
 0x300   : > { %v1758_v18 = vpop.f32.mrb[0].mxu1 }
 0x301   : > { %v930_v20 = vpop.f32.mrb[1].mxu1  ;;  %v939_v22 = vadd.f32 %v1758_v18, %v3032_v19 }
 0x302   : > { %v1759_v21 = vpop.f32.mrb[2].mxu1  ;;  %v931_v24 = vadd.f32 %v3032_v19, %v930_v20 }
 0x303   : > { %v942_v23 = vadd.f32 %v1759_v21, %v3032_v19  ;;  %v933_v32 = vpop.f32.mrb[3].mxu1 }
 0x304   : > { %v934_v25 = vadd.f32 %v3032_v19, %v933_v32 }
 0x305   : > { %v1557_v26 = vpack.c.bf16 %v942_v23, %v939_v22 }
 0x306   : > { %v1552_v27 = vpack.c.bf16 %v934_v25, %v931_v24 }
 0x307   : > { %1629 = vst [vmem:[%s2962_s25 + $0x8] sm:$0xff] %v1557_v26  }
 0x308   : > { %1553 = vst [vmem:[%s2962_s25] sm:$0xff] %v1552_v27   ;;  %v1762_v28 = vpop.f32.mrb[4].mxu1 }
 0x309   : > { %v946_v29 = vpop.f32.mrb[5].mxu1  ;;  %v955_v31 = vadd.f32 %v1762_v28, %v3032_v19 }
 0x30a   : > { %v1763_v30 = vpop.f32.mrb[6].mxu1  ;;  %v947_v35 = vadd.f32 %v3032_v19, %v946_v29 }
 0x30b   : > { %v958_v33 = vadd.f32 %v1763_v30, %v3032_v19  ;;  %v949_v34 = vpop.f32.mrb[7].mxu1 }
 0x30c   : > { %v950_v36 = vadd.f32 %v3032_v19, %v949_v34 }
 0x30d   : > { %v1567_v37 = vpack.c.bf16 %v958_v33, %v955_v31 }
 0x30e   : > { %v1562_v38 = vpack.c.bf16 %v950_v36, %v947_v35 }
 0x30f   : > { %1631 = vst [vmem:[%s2962_s25 + $0x18] sm:$0xff] %v1567_v37  }
 0x310   : > { %1630 = vst [vmem:[%s2962_s25 + $0x10] sm:$0xff] %v1562_v38   ;;  %v1766_v39 = vpop.f32.mrb[8].mxu1 }
 0x311   : > { %v962_v40 = vpop.f32.mrb[9].mxu1  ;;  %v971_v42 = vadd.f32 %v1766_v39, %v3032_v19 }
 0x312   : > { %v1767_v41 = vpop.f32.mrb[10].mxu1  ;;  %v963_v45 = vadd.f32 %v3032_v19, %v962_v40 }
 0x313   : > { %v974_v43 = vadd.f32 %v1767_v41, %v3032_v19  ;;  %v965_v44 = vpop.f32.mrb[11].mxu1 }
 0x314   : > { %v966_v46 = vadd.f32 %v3032_v19, %v965_v44 }
 0x315   : > { %v1577_v47 = vpack.c.bf16 %v974_v43, %v971_v42 }
 0x316   : > { %v1572_v48 = vpack.c.bf16 %v966_v46, %v963_v45 }
 0x317   : > { %1633 = vst [vmem:[%s2962_s25 + $0x28] sm:$0xff] %v1577_v47  }
 0x318   : > { %1632 = vst [vmem:[%s2962_s25 + $0x20] sm:$0xff] %v1572_v48   ;;  %v1770_v49 = vpop.f32.mrb[12].mxu1 }
 0x319   : > { %v978_v50 = vpop.f32.mrb[13].mxu1  ;;  %v987_v52 = vadd.f32 %v1770_v49, %v3032_v19 }
 0x31a   : > { %v1771_v51 = vpop.f32.mrb[14].mxu1  ;;  %v979_v55 = vadd.f32 %v3032_v19, %v978_v50 }
 0x31b   : > { %v990_v53 = vadd.f32 %v1771_v51, %v3032_v19  ;;  %v981_v54 = vpop.f32.mrb[15].mxu1 }
 0x31c   : > { %v982_v56 = vadd.f32 %v3032_v19, %v981_v54 }
 0x31d   : > { %v1587_v57 = vpack.c.bf16 %v990_v53, %v987_v52 }
 0x31e   : > { %v1582_v58 = vpack.c.bf16 %v982_v56, %v979_v55 }
 0x31f   : > { %1635 = vst [vmem:[%s2962_s25 + $0x38] sm:$0xff] %v1587_v57  }
 0x320   : > { %1634 = vst [vmem:[%s2962_s25 + $0x30] sm:$0xff] %v1582_v58   ;;  %v1774_v59 = vpop.f32.mrb[16].mxu1 }
 0x321   : > { %v994_v60 = vpop.f32.mrb[17].mxu1  ;;  %v1003_v62 = vadd.f32 %v1774_v59, %v3032_v19 }
 0x322   : > { %v1775_v61 = vpop.f32.mrb[18].mxu1  ;;  %v995_v1 = vadd.f32 %v3032_v19, %v994_v60 }
 0x323   : > { %v1006_v63 = vadd.f32 %v1775_v61, %v3032_v19  ;;  %v997_v0 = vpop.f32.mrb[19].mxu1 }
 0x324   : > { %v998_v2 = vadd.f32 %v3032_v19, %v997_v0 }
 0x325   : > { %v1597_v3 = vpack.c.bf16 %v1006_v63, %v1003_v62 }
 0x326   : > { %v1592_v4 = vpack.c.bf16 %v998_v2, %v995_v1 }
 0x327   : > { %1637 = vst [vmem:[%s2962_s25 + $0x48] sm:$0xff] %v1597_v3  }
 0x328   : > { %1636 = vst [vmem:[%s2962_s25 + $0x40] sm:$0xff] %v1592_v4   ;;  %v1778_v5 = vpop.f32.mrb[20].mxu1 }
 0x329   : > { %v1010_v6 = vpop.f32.mrb[21].mxu1  ;;  %v1019_v8 = vadd.f32 %v1778_v5, %v3032_v19 }
 0x32a   : > { %v1779_v7 = vpop.f32.mrb[22].mxu1  ;;  %v1011_v11 = vadd.f32 %v3032_v19, %v1010_v6 }
 0x32b   : > { %v1022_v9 = vadd.f32 %v1779_v7, %v3032_v19  ;;  %v1013_v10 = vpop.f32.mrb[23].mxu1 }
 0x32c   : > { %v1014_v12 = vadd.f32 %v3032_v19, %v1013_v10 }
 0x32d   : > { %v1607_v13 = vpack.c.bf16 %v1022_v9, %v1019_v8 }
 0x32e   : > { %v1602_v14 = vpack.c.bf16 %v1014_v12, %v1011_v11 }
 0x32f   : > { %1639 = vst [vmem:[%s2962_s25 + $0x58] sm:$0xff] %v1607_v13  }
 0x330   : > { %1638 = vst [vmem:[%s2962_s25 + $0x50] sm:$0xff] %v1602_v14   ;;  %v1782_v15 = vpop.f32.mrb[24].mxu1 }
 0x331   : > { %v1026_v16 = vpop.f32.mrb[25].mxu1  ;;  %v1035_v18 = vadd.f32 %v1782_v15, %v3032_v19 }
 0x332   : > { %v1783_v17 = vpop.f32.mrb[26].mxu1  ;;  %v1027_v22 = vadd.f32 %v3032_v19, %v1026_v16 }
 0x333   : > { %v1038_v20 = vadd.f32 %v1783_v17, %v3032_v19  ;;  %v1029_v21 = vpop.f32.mrb[27].mxu1 }
 0x334   : > { %v1030_v23 = vadd.f32 %v3032_v19, %v1029_v21 }
 0x335   : > { %v1617_v32 = vpack.c.bf16 %v1038_v20, %v1035_v18 }
 0x336   : > { %v1612_v24 = vpack.c.bf16 %v1030_v23, %v1027_v22 }
 0x337   : > { %1641 = vst [vmem:[%s2962_s25 + $0x68] sm:$0xff] %v1617_v32  }
 0x338   : > { %1640 = vst [vmem:[%s2962_s25 + $0x60] sm:$0xff] %v1612_v24   ;;  %v1786_v25 = vpop.f32.mrb[28].mxu1 }
 0x339   : > { %v1042_v26 = vpop.f32.mrb[29].mxu1  ;;  %v1051_v28 = vadd.f32 %v1786_v25, %v3032_v19 }
 0x33a   : > { %v1787_v27 = vpop.f32.mrb[30].mxu1  ;;  %v1043_v31 = vadd.f32 %v3032_v19, %v1042_v26 }
 0x33b   : > { %v1054_v29 = vadd.f32 %v1787_v27, %v3032_v19  ;;  %v1045_v30 = vpop.f32.mrb[31].mxu1 }
 0x33c   : > { %v1046_v33 = vadd.f32 %v3032_v19, %v1045_v30 }
 0x33d   : > { %v1627_v34 = vpack.c.bf16 %v1054_v29, %v1051_v28 }
 0x33e   : > { %v1622_v35 = vpack.c.bf16 %v1046_v33, %v1043_v31 }
 0x33f   : > { %1643 = vst [vmem:[%s2962_s25 + $0x78] sm:$0xff] %v1627_v34  }
 0x340   : > { %1642 = vst [vmem:[%s2962_s25 + $0x70] sm:$0xff] %v1622_v35  }
 0x341 PF: > { %s1217_s16 = sld [smem:[#allocation4 + %s2513_s12]] }
 0x347   : > { %p1507_p1 = scmp.ne.s32.totalorder %s1217_s16, 0 }
 0x348   : > { %v2366_v36 = vmov (!%p1507_p1), 0  }
 0x349   : > { %1221 = sbr.rel (%p1507_p1) target bundleno = 857 (0x359), region = 68  ;;  %1222 = vst [vmem:[%s2962_s25] sm:$0xf] (!%p1507_p1), %v2366_v36  ;;  %1223 = vst [vmem:[%s2962_s25 + $0x4] sm:$0xf] (!%p1507_p1), %v2366_v36 }
 0x34a   : > { %1224 = vst [vmem:[%s2962_s25 + $0x8] sm:$0xf] (!%p1507_p1), %v2366_v36  ;;  %1225 = vst [vmem:[%s2962_s25 + $0xc] sm:$0xf] (!%p1507_p1), %v2366_v36 }
 0x34b   : > { %1226 = vst [vmem:[%s2962_s25 + $0x10] sm:$0xf] (!%p1507_p1), %v2366_v36  ;;  %1227 = vst [vmem:[%s2962_s25 + $0x14] sm:$0xf] (!%p1507_p1), %v2366_v36 }
 0x34c   : > { %1228 = vst [vmem:[%s2962_s25 + $0x18] sm:$0xf] (!%p1507_p1), %v2366_v36  ;;  %1229 = vst [vmem:[%s2962_s25 + $0x1c] sm:$0xf] (!%p1507_p1), %v2366_v36 }
 0x34d   : > { %1230 = vst [vmem:[%s2962_s25 + $0x20] sm:$0xf] (!%p1507_p1), %v2366_v36  ;;  %1231 = vst [vmem:[%s2962_s25 + $0x24] sm:$0xf] (!%p1507_p1), %v2366_v36 }
 0x34e   : > { %1232 = vst [vmem:[%s2962_s25 + $0x28] sm:$0xf] (!%p1507_p1), %v2366_v36  ;;  %1233 = vst [vmem:[%s2962_s25 + $0x2c] sm:$0xf] (!%p1507_p1), %v2366_v36 }
 0x34f   : > { %1234 = vst [vmem:[%s2962_s25 + $0x30] sm:$0xf] (!%p1507_p1), %v2366_v36  ;;  %1235 = vst [vmem:[%s2962_s25 + $0x34] sm:$0xf] (!%p1507_p1), %v2366_v36 }
 0x350   : > { %1236 = vst [vmem:[%s2962_s25 + $0x38] sm:$0xf] %v2366_v36  ;;  %1237 = vst [vmem:[%s2962_s25 + $0x3c] sm:$0xf] %v2366_v36 }
 0x351   : > { %1238 = vst [vmem:[%s2962_s25 + $0x40] sm:$0xf] %v2366_v36  ;;  %1239 = vst [vmem:[%s2962_s25 + $0x44] sm:$0xf] %v2366_v36 }
 0x352   : > { %1240 = vst [vmem:[%s2962_s25 + $0x48] sm:$0xf] %v2366_v36  ;;  %1241 = vst [vmem:[%s2962_s25 + $0x4c] sm:$0xf] %v2366_v36 }
 0x353   : > { %1242 = vst [vmem:[%s2962_s25 + $0x50] sm:$0xf] %v2366_v36  ;;  %1243 = vst [vmem:[%s2962_s25 + $0x54] sm:$0xf] %v2366_v36 }
 0x354   : > { %1244 = vst [vmem:[%s2962_s25 + $0x58] sm:$0xf] %v2366_v36  ;;  %1245 = vst [vmem:[%s2962_s25 + $0x5c] sm:$0xf] %v2366_v36 }
 0x355   : > { %1246 = vst [vmem:[%s2962_s25 + $0x60] sm:$0xf] %v2366_v36  ;;  %1247 = vst [vmem:[%s2962_s25 + $0x64] sm:$0xf] %v2366_v36 }
 0x356   : > { %1248 = vst [vmem:[%s2962_s25 + $0x68] sm:$0xf] %v2366_v36  ;;  %1249 = vst [vmem:[%s2962_s25 + $0x6c] sm:$0xf] %v2366_v36 }
 0x357   : > { %1250 = vst [vmem:[%s2962_s25 + $0x70] sm:$0xf] %v2366_v36  ;;  %1251 = vst [vmem:[%s2962_s25 + $0x74] sm:$0xf] %v2366_v36 }
 0x358   : > { %1252 = vst [vmem:[%s2962_s25 + $0x78] sm:$0xf] %v2366_v36  ;;  %1253 = vst [vmem:[%s2962_s25 + $0x7c] sm:$0xf] %v2366_v36 }
 0x359 PF: > { %s1548_s4 = sshll.u32 %s2513_s12, 11  ;;  %s3315_s24 = sld [smem:[#allocation47_spill]] }
 0x35a   : > { %s1268_s14 = sshll.u32 %s2962_s25, 4  ;;  %s1255_s15 = scalar_lea.sflag [#allocation7], %s2922_s5  ;;  %s3122_s14 = int_to_ptr.vmem [resolvable:$true] %s1268_s14 }
 0x35b   : > { %s2175_s10 = scalar_lea.vmem %s3122_s14, 2048  ;;  %p3317_p9 = scmp.ne.s32.totalorder %s3281_s28, 0 }
 0x35c   : > { %p2176_p12 = scmp.ne.s32.totalorder %s3122_s14, %s2175_s10  ;;  %s2367_s20 = smov [#allocation14]  }
 0x35d   : > { %s2179_s29 = sshll.u32 %s2367_s20, 4  ;;  %s2180_s29 = int_to_ptr.vmem [resolvable:$false] %s2179_s29 }
 0x35e   : > { %p2177_p3 = pnand %p2176_p12, %p3317_p9  ;;  %s2181_s12 = scalar_lea.vmem %s2180_s29, 4096 }
 0x35f   : > { %s3316_s2 = smov %s3315_s24  ;;  %s3119_s27 = scalar_lea.hbm %s3315_s24, %s1548_s4 }
 0x360   : > { %p2178_p2 = pneg %p2177_p3  ;;  %p2182_p4 = scmp.lt.s32.totalorder %s3122_s14, %s2180_s29 }
 0x361   : > { %p2183_p5 = scmp.lt.s32.totalorder %s2181_s12, %s2175_s10 }
 0x363   : > { %p2184_p10 = por %p2183_p5, %p2182_p4 }
 0x365   : > { %p2185_p0 = pnand %p2184_p10, %p2178_p2 }
 0x367   : > { %2188 = shalt.err (!%p2185_p0)
}
 0x368   : > { %s2189_s19 = scalar_lea.hbm %s3119_s27, 2048  ;;  %s2193_s18 = scalar_lea.hbm %s3316_s2, 18432 }
 0x369   : > { %p2190_p6 = scmp.ne.s32.totalorder %s3119_s27, %s2189_s19  ;;  %p2194_p7 = scmp.lt.u32.totalorder %s3119_s27, %s3316_s2 }
 0x36a   : > { %p2195_p8 = scmp.lt.u32.totalorder %s2193_s18, %s2189_s19  ;;  %p2197_p12 = scmp.lt.u32.totalorder %s2189_s19, %s3119_s27 }
 0x36b   : > { %p2191_p11 = pnand %p2190_p6, %p3317_p9 }
 0x36c   : > { %p2196_p1 = por %p2195_p8, %p2194_p7 }
 0x36d   : > { %p2192_p13 = pneg %p2191_p11 }
 0x36e   : > { %p2198_p3 = por %p2197_p12, %p2196_p1 }
 0x370   : > { %p2199_p2 = pnand %p2198_p3, %p2192_p13 }
 0x372   : > { %2202 = shalt.err (!%p2199_p2)
}
 0x373   : > { %s2368_s4 = smov 64   ;;  %s2369_s17 = smov 4  }
 0x374   : > { %1806 = dma.vmem_to_hbm [thread:$0]  (%p3317_p9), %s3122_s14, 2048, %s3119_s27, %s1255_s15, %s2368_s4, %s2368_s4, %s2369_s17  }
 0x375 PF: > { %p1837_p4 = scmp.ge.s32.totalorder %s2355_s11, 2  ;;  %s1283_s23 = sand.u32 1, %s2343_s8  }
 0x376   : > { %p3318_p5 = scmp.ne.s32.totalorder %s3283_s6, 0  ;;  %s1284_s24 = scalar_lea.sflag [#allocation7], %s1283_s23 }
 0x378   : > { %p1833_p10 = pnand %p1837_p4, %p3318_p5 }
 0x37a   : > { %2290 = dma.done.wait (!%p1833_p10), %s1284_s24, 2048  }
 0x37b   : > { %2292 = vsyncadd (!%p1833_p10), %s1284_s24, 4294965248  ;;  %s3319_s10 = sld [smem:[#allocation30_spill]]  ;;  %s3320_s24 = sld [smem:[#allocation39_spill]] }
 0x37c   : > { %s3321_s28 = sld [smem:[#allocation31_spill]]  ;;  %s3322_s27 = sld [smem:[#allocation41_spill]] }
 0x37d   : > { %s3323_s5 = sld [smem:[#allocation32_spill]]  ;;  %s3324_s29 = sld [smem:[#allocation33_spill]] }
 0x37e   : > { %s3325_s30 = sld [smem:[#allocation36_spill]]  ;;  %s3326_s11 = sld [smem:[#allocation34_spill]] }
 0x37f   : > { %s3327_s6 = sld [smem:[#allocation40_spill]]  ;;  %p32_p9 = scmp.ge.s32.totalorder %s2516_s13, 11  }
 0x380   : > { %s3328_s0 = smov %s2299_s21  ;;  %s3329_s21 = smov %s2303_s22 }
 0x381   : > { %s3330_s22 = smov %s2876_s3  ;;  %s3331_s23 = smov %s2311_s1 }
 0x382   : > { %s3332_s1 = smov %s3319_s10  ;;  %s3333_s25 = smov %s2323_s26 }
 0x383   : > { %s3334_s26 = smov %s3321_s28  ;;  %s3335_s28 = smov %s3323_s5 }
 0x384   : > { %s3336_s8 = smov %s2347_s9  ;;  %s3337_s9 = smov %s3326_s11 }
 0x385   : > { %s3338_s10 = smov %s3327_s6  ;;  %s3339_s11 = smov %s2516_s13 }
 0x386   :  { %34 = sbr.rel (!%p32_p9) target bundleno = 35 (0x23), region = 141 }
 0x38d   :  { %1289 = vsyncpa [#allocation6], 1 }
 0x38e   :  { %1291 = vsyncpa [#allocation6 + $0x1], 1 }
 0x38f   :  { %1292 = vsyncpa [#allocation9], 1 }
 0x390   :  { %1294 = vsyncpa [#allocation9 + $0x1], 1 }
 0x391   :  { %1295 = vsyncpa [#allocation12], 1 }
 0x392   :  { %1297 = vsyncpa [#allocation12 + $0x1], 1 }
 0x393   :  { %1298 = vsyncpa [#allocation7], 1 }
 0x394   :  { %1300 = vsyncpa [#allocation7 + $0x1], 1 }

</bundles_post_ra>
